<compile_context>
chip_gen: v6e
topology: v6e:2x2x1
jax: 0.10.0
libtpu: 0.0.40
codegen_flags: <defaults>
</compile_context>

<pallas_src>
import functools

import jax
import jax.numpy as jnp
from jax.experimental import pallas as pl
from jax.experimental.pallas import tpu as pltpu


# ---------------------------------------------------------------------------
# Fused Pallas kernel: conv1 + all BasicBlocks + max-pool + linear
# ---------------------------------------------------------------------------
def _restext_fused_kernel(feat_ref, *refs, B, L, KN, C, num_blocks):
    """Whole ResText trunk in one kernel.

    feat_ref   : (B, L+6, Cin0)  zero-padded embedding features (f32)
    refs       : w1 (7*Cin0, KN), t1 (1, KN),
                 [wA, tA, wB, tB] * num_blocks  (w: (7*KN, KN), t: (1, KN)),
                 wl (KN, C), bl (1, C),
                 o_ref (B, C),
                 pad_ref scratch (B, L+6, KN)  -- padded activation buffer
    All conv weights have bias + eval-BatchNorm folded in (w*scale, b*scale+shift).
    """
    w1_ref, t1_ref = refs[0], refs[1]
    block_refs = refs[2:2 + 4 * num_blocks]
    wl_ref, bl_ref, o_ref, pad_ref = refs[2 + 4 * num_blocks:]

    def im2col(src_ref, cin):
        # src_ref: (B, L+6, cin) padded activation -> (B*L, 7*cin) patches.
        taps = [src_ref[:, d:d + L, :] for d in range(7)]       # 7 x (B, L, cin)
        return jnp.concatenate(taps, axis=-1).reshape(B * L, 7 * cin)

    def conv_bn(src_ref, cin, w_ref, t_ref):
        p = im2col(src_ref, cin)                                # (B*L, 7*cin)
        y = jnp.dot(p, w_ref[...], preferred_element_type=jnp.float32)
        return y + t_ref[...]                                   # folded bias+BN

    cin0 = feat_ref.shape[-1]

    # conv1 = ConvBlock + BN + ReLU
    out = jnp.maximum(conv_bn(feat_ref, cin0, w1_ref, t1_ref), 0.0)   # (B*L, KN)

    # Zero the padded activation scratch once; halo rows stay zero afterwards.
    pad_ref[...] = jnp.zeros((B, L + 6, KN), jnp.float32)

    # BasicBlocks: (Conv+BN+ReLU[+Dropout=id]) -> (Conv+BN) + residual -> ReLU
    for i in range(num_blocks):
        wA, tA, wB, tB = block_refs[4 * i:4 * i + 4]
        pad_ref[:, 3:3 + L, :] = out.reshape(B, L, KN)
        h = jnp.maximum(conv_bn(pad_ref, KN, wA, tA), 0.0)
        pad_ref[:, 3:3 + L, :] = h.reshape(B, L, KN)
        h = conv_bn(pad_ref, KN, wB, tB)
        out = jnp.maximum(h + out, 0.0)                         # residual + ReLU

    # AdaptiveMaxPool1d(1) over L, then Linear (dropout = identity in eval).
    pooled = jnp.max(out.reshape(B, L, KN), axis=1)             # (B, KN)
    o_ref[...] = (jnp.dot(pooled, wl_ref[...],
                          preferred_element_type=jnp.float32) + bl_ref[...])


def restext_fused(feat_pad, conv1, blocks, linear, *, L, KN, C):
    """feat_pad: (B, L+6, Cin0) -> logits (B, C).  Single pallas_call."""
    B = feat_pad.shape[0]
    num_blocks = len(blocks)
    w1, t1 = conv1
    wl, bl = linear
    flat = []
    for (wA, tA), (wB, tB) in blocks:
        flat += [wA, tA, wB, tB]

    kernel = functools.partial(_restext_fused_kernel,
                               B=B, L=L, KN=KN, C=C, num_blocks=num_blocks)
    n_in = 3 + 4 * num_blocks + 2
    return pl.pallas_call(
        kernel,
        out_shape=jax.ShapeDtypeStruct((B, C), jnp.float32),
        in_specs=[pl.BlockSpec(memory_space=pltpu.MemorySpace.VMEM)] * n_in,
        out_specs=pl.BlockSpec(memory_space=pltpu.MemorySpace.VMEM),
        scratch_shapes=[pltpu.VMEM((B, L + 6, KN), jnp.float32)],
    )(feat_pad, w1, t1, *flat, wl, bl.reshape(1, -1))


# ---------------------------------------------------------------------------
# Deterministic parameter construction (+ bias/BN folding)
# ---------------------------------------------------------------------------
def make_convblock_params(key, cin, cout):
    """Exact merged 7-tap weight of conv3+conv5+conv7 (PyTorch-style uniform
    init per conv), returned as (7, Cin, Cout) plus summed bias (Cout,)."""
    keys = jax.random.split(key, 6)

    def u(k, shape, fan):
        bound = 1.0 / (fan ** 0.5)
        return jax.random.uniform(k, shape, jnp.float32, -bound, bound)

    w3 = u(keys[0], (cout, cin, 3), cin * 3)
    w5 = u(keys[1], (cout, cin, 5), cin * 5)
    w7 = u(keys[2], (cout, cin, 7), cin * 7)
    b3 = u(keys[3], (cout,), cin * 3)
    b5 = u(keys[4], (cout,), cin * 5)
    b7 = u(keys[5], (cout,), cin * 7)

    w = w7
    w = w.at[:, :, 1:6].add(w5)   # k=5, pad=2 aligns to taps 1..5
    w = w.at[:, :, 2:5].add(w3)   # k=3, pad=1 aligns to taps 2..4
    w = jnp.transpose(w, (2, 1, 0))                # (7, Cin, Cout)
    return w, b3 + b5 + b7


def make_bn_params(key, c, eps=1e-5):
    """Eval-mode BatchNorm1d folded into (scale, shift)."""
    kg, kb, km, kv = jax.random.split(key, 4)
    gamma = 1.0 + 0.1 * jax.random.normal(kg, (c,), jnp.float32)
    beta = 0.1 * jax.random.normal(kb, (c,), jnp.float32)
    mean = 0.1 * jax.random.normal(km, (c,), jnp.float32)
    var = 1.0 + 0.1 * jax.random.uniform(kv, (c,), jnp.float32)
    scale = gamma / jnp.sqrt(var + eps)
    shift = beta - mean * scale
    return scale, shift


def fold_conv_bn(w7, b, scale, shift):
    """Fold conv bias + eval BN into the im2col weight.
    BN(eval): y = scale*(Wx + b) + shift = (scale*W)x + (scale*b + shift)."""
    cout = w7.shape[2]
    w_eff = (w7 * scale[None, None, :]).reshape(-1, cout)   # (7*Cin, Cout)
    t_eff = (b * scale + shift).reshape(1, cout)
    return w_eff, t_eff


# ---------------------------------------------------------------------------
# Full ResText forward (eval mode, score_function=None branch)
# ---------------------------------------------------------------------------
@jax.jit
def restext_forward(word, word_pos, params):
    # Embedding lookups + concat (glue).  Dropout = identity in eval mode.
    word_emb = jnp.take(params["word_embed"], word, axis=0)       # (B, L, WD)
    pos_emb = jnp.take(params["pos_embed"], word_pos, axis=0)     # (B, L, PD)
    feat = jnp.concatenate([word_emb, pos_emb], axis=-1)          # (B, L, WD+PD)
    feat_pad = jnp.pad(feat, ((0, 0), (3, 3), (0, 0)))            # single host pad

    L = word.shape[1]
    KN = params["conv1"][0].shape[1]
    C = params["linear"][0].shape[1]
    return restext_fused(feat_pad, params["conv1"], params["blocks"],
                         params["linear"], L=L, KN=KN, C=C)


# Pure-JAX reference (same folded params, previously-verified per-tap form).
def restext_reference(word, word_pos, params):
    word_emb = jnp.take(params["word_embed"], word, axis=0)
    pos_emb = jnp.take(params["pos_embed"], word_pos, axis=0)
    feat = jnp.concatenate([word_emb, pos_emb], axis=-1)

    def conv_bn(x, w_eff, t_eff):
        B, L, cin = x.shape
        xp = jnp.pad(x, ((0, 0), (3, 3), (0, 0)))
        w = w_eff.reshape(7, cin, -1)
        acc = jnp.zeros((B, L, w.shape[-1]), jnp.float32) + t_eff
        for d in range(7):
            acc = acc + jnp.einsum("blc,co->blo", xp[:, d:d + L, :], w[d])
        return acc

    w1, t1 = params["conv1"]
    out = jnp.maximum(conv_bn(feat, w1, t1), 0.0)
    for (wA, tA), (wB, tB) in params["blocks"]:
        h = jnp.maximum(conv_bn(out, wA, tA), 0.0)
        h = conv_bn(h, wB, tB)
        out = jnp.maximum(h + out, 0.0)
    pooled = jnp.max(out, axis=1)
    wl, bl = params["linear"]
    return pooled @ wl + bl


# ---------------------------------------------------------------------------
if __name__ == "__main__":
    key = jax.random.PRNGKey(0)
    B, L = 2, 16                 # batch, word_maxlen
    WN, WD = 50, 24              # vocab size, word embedding dim
    PN, PD = L + 1, 8            # position vocab, position dim
    KN, C = 32, 4                # kernel_num, num_classes
    num_blocks = 2

    ks = jax.random.split(key, 16)

    word_embed = jax.random.normal(ks[0], (WN, WD), jnp.float32)
    pos_embed = jax.random.normal(ks[1], (PN, PD), jnp.float32)
    pos_embed = pos_embed.at[0].set(0.0)        # padding_idx=0

    w1m, b1 = make_convblock_params(ks[2], WD + PD, KN)
    s1, t1 = make_bn_params(ks[3], KN)
    conv1 = fold_conv_bn(w1m, b1, s1, t1)

    blocks = []
    for i in range(num_blocks):
        ka, kb_, kc, kd = jax.random.split(ks[4 + i], 4)
        wAm, bA = make_convblock_params(ka, KN, KN)
        sA, tA = make_bn_params(kb_, KN)
        wBm, bB = make_convblock_params(kc, KN, KN)
        sB, tB = make_bn_params(kd, KN)
        blocks.append((fold_conv_bn(wAm, bA, sA, tA),
                       fold_conv_bn(wBm, bB, sB, tB)))

    lin_bound = 1.0 / (KN ** 0.5)
    lin_w = jax.random.uniform(ks[10], (KN, C), jnp.float32, -lin_bound, lin_bound)
    lin_b = jax.random.uniform(ks[11], (C,), jnp.float32, -lin_bound, lin_bound)

    params = {
        "word_embed": word_embed,
        "pos_embed": pos_embed,
        "conv1": conv1,
        "blocks": blocks,
        "linear": (lin_w, lin_b),
    }

    word = jax.random.randint(ks[12], (B, L), 1, WN)
    word_pos = jnp.broadcast_to(jnp.arange(1, L + 1, dtype=jnp.int32), (B, L))

    logits = restext_forward(word, word_pos, params)
    jax.block_until_ready(logits)
    assert logits.shape == (B, C)
    assert bool(jnp.all(jnp.isfinite(logits)))

    ref = restext_reference(word, word_pos, params)
    assert bool(jnp.allclose(logits, ref, atol=2e-3, rtol=2e-3)), \
        float(jnp.max(jnp.abs(logits - ref)))
    print("KERNEL_OK")
</pallas_src>

<mosaic_0001>
module attributes {stable_mosaic.version = 11 : i64} {
  func.func @_restext_fused_kernel(%arg0: memref<2x22x32xf32, #tpu.memory_space<vmem>>, %arg1: memref<224x32xf32, #tpu.memory_space<vmem>>, %arg2: memref<1x32xf32, #tpu.memory_space<vmem>>, %arg3: memref<224x32xf32, #tpu.memory_space<vmem>>, %arg4: memref<1x32xf32, #tpu.memory_space<vmem>>, %arg5: memref<224x32xf32, #tpu.memory_space<vmem>>, %arg6: memref<1x32xf32, #tpu.memory_space<vmem>>, %arg7: memref<224x32xf32, #tpu.memory_space<vmem>>, %arg8: memref<1x32xf32, #tpu.memory_space<vmem>>, %arg9: memref<224x32xf32, #tpu.memory_space<vmem>>, %arg10: memref<1x32xf32, #tpu.memory_space<vmem>>, %arg11: memref<32x4xf32, #tpu.memory_space<vmem>>, %arg12: memref<1x4xf32, #tpu.memory_space<vmem>>, %arg13: memref<2x4xf32, #tpu.memory_space<vmem>>, %arg14: memref<2x22x32xf32, #tpu.memory_space<vmem>>) attributes {dimension_semantics = [], scalar_prefetch = 0 : i64, scratch_operands = 1 : i64, tpu.core_type = #tpu.core_type<tc>} {
    %c0 = arith.constant 0 : index
    %c0_0 = arith.constant 0 : index
    %c0_1 = arith.constant 0 : index
    %0 = vector.load %arg0[%c0, %c0_0, %c0_1] : memref<2x22x32xf32, #tpu.memory_space<vmem>>, vector<2x16x32xf32>
    %c0_2 = arith.constant 0 : index
    %c1 = arith.constant 1 : index
    %c0_3 = arith.constant 0 : index
    %1 = vector.load %arg0[%c0_2, %c1, %c0_3] : memref<2x22x32xf32, #tpu.memory_space<vmem>>, vector<2x16x32xf32>
    %c0_4 = arith.constant 0 : index
    %c2 = arith.constant 2 : index
    %c0_5 = arith.constant 0 : index
    %2 = vector.load %arg0[%c0_4, %c2, %c0_5] : memref<2x22x32xf32, #tpu.memory_space<vmem>>, vector<2x16x32xf32>
    %c0_6 = arith.constant 0 : index
    %c3 = arith.constant 3 : index
    %c0_7 = arith.constant 0 : index
    %3 = vector.load %arg0[%c0_6, %c3, %c0_7] : memref<2x22x32xf32, #tpu.memory_space<vmem>>, vector<2x16x32xf32>
    %c0_8 = arith.constant 0 : index
    %c4 = arith.constant 4 : index
    %c0_9 = arith.constant 0 : index
    %4 = vector.load %arg0[%c0_8, %c4, %c0_9] : memref<2x22x32xf32, #tpu.memory_space<vmem>>, vector<2x16x32xf32>
    %c0_10 = arith.constant 0 : index
    %c5 = arith.constant 5 : index
    %c0_11 = arith.constant 0 : index
    %5 = vector.load %arg0[%c0_10, %c5, %c0_11] : memref<2x22x32xf32, #tpu.memory_space<vmem>>, vector<2x16x32xf32>
    %c0_12 = arith.constant 0 : index
    %c6 = arith.constant 6 : index
    %c0_13 = arith.constant 0 : index
    %6 = vector.load %arg0[%c0_12, %c6, %c0_13] : memref<2x22x32xf32, #tpu.memory_space<vmem>>, vector<2x16x32xf32>
    %7 = tpu.concatenate %0, %1, %2, %3, %4, %5, %6 in 2 : vector<2x16x32xf32>, vector<2x16x32xf32>, vector<2x16x32xf32>, vector<2x16x32xf32>, vector<2x16x32xf32>, vector<2x16x32xf32>, vector<2x16x32xf32> -> vector<2x16x224xf32>
    %8 = vector.shape_cast %7 : vector<2x16x224xf32> to vector<32x224xf32>
    %c0_14 = arith.constant 0 : index
    %c0_15 = arith.constant 0 : index
    %9 = vector.load %arg1[%c0_14, %c0_15] : memref<224x32xf32, #tpu.memory_space<vmem>>, vector<224x32xf32>
    %cst = arith.constant dense<0.000000e+00> : vector<32x32xf32>
    %10 = tpu.matmul %8, %9, %cst {dimension_numbers = #tpu.dot_dimension_numbers<[1], [0], [0], [1], [0, 0, 1, 1], [], []>} : vector<32x224xf32>, vector<224x32xf32>, vector<32x32xf32> -> vector<32x32xf32>
    %c0_16 = arith.constant 0 : index
    %c0_17 = arith.constant 0 : index
    %11 = vector.load %arg2[%c0_16, %c0_17] : memref<1x32xf32, #tpu.memory_space<vmem>>, vector<1x32xf32>
    %12 = vector.broadcast %11 : vector<1x32xf32> to vector<32x32xf32>
    %13 = arith.addf %10, %12 : vector<32x32xf32>
    %cst_18 = arith.constant 0.000000e+00 : f32
    %14 = vector.broadcast %cst_18 : f32 to vector<32x32xf32>
    %15 = arith.maximumf %13, %14 : vector<32x32xf32>
    %cst_19 = arith.constant 0.000000e+00 : f32
    %16 = vector.broadcast %cst_19 : f32 to vector<2x22x32xf32>
    %c0_20 = arith.constant 0 : index
    %c0_21 = arith.constant 0 : index
    %c0_22 = arith.constant 0 : index
    %17 = vector.load %arg14[%c0_20, %c0_21, %c0_22] : memref<2x22x32xf32, #tpu.memory_space<vmem>>, vector<2x22x32xf32>
    tpu.vector_store %arg14[%c0_20, %c0_21, %c0_22], %16 {strides = array<i32>} : memref<2x22x32xf32, #tpu.memory_space<vmem>>, vector<2x22x32xf32>,
    %18 = vector.shape_cast %15 : vector<32x32xf32> to vector<2x16x32xf32>
    %c0_23 = arith.constant 0 : index
    %c3_24 = arith.constant 3 : index
    %c0_25 = arith.constant 0 : index
    %19 = vector.load %arg14[%c0_23, %c3_24, %c0_25] : memref<2x22x32xf32, #tpu.memory_space<vmem>>, vector<2x16x32xf32>
    tpu.vector_store %arg14[%c0_23, %c3_24, %c0_25], %18 {strides = array<i32>} : memref<2x22x32xf32, #tpu.memory_space<vmem>>, vector<2x16x32xf32>,
    %c0_26 = arith.constant 0 : index
    %c0_27 = arith.constant 0 : index
    %c0_28 = arith.constant 0 : index
    %20 = vector.load %arg14[%c0_26, %c0_27, %c0_28] : memref<2x22x32xf32, #tpu.memory_space<vmem>>, vector<2x16x32xf32>
    %c0_29 = arith.constant 0 : index
    %c1_30 = arith.constant 1 : index
    %c0_31 = arith.constant 0 : index
    %21 = vector.load %arg14[%c0_29, %c1_30, %c0_31] : memref<2x22x32xf32, #tpu.memory_space<vmem>>, vector<2x16x32xf32>
    %c0_32 = arith.constant 0 : index
    %c2_33 = arith.constant 2 : index
    %c0_34 = arith.constant 0 : index
    %22 = vector.load %arg14[%c0_32, %c2_33, %c0_34] : memref<2x22x32xf32, #tpu.memory_space<vmem>>, vector<2x16x32xf32>
    %c0_35 = arith.constant 0 : index
    %c3_36 = arith.constant 3 : index
    %c0_37 = arith.constant 0 : index
    %23 = vector.load %arg14[%c0_35, %c3_36, %c0_37] : memref<2x22x32xf32, #tpu.memory_space<vmem>>, vector<2x16x32xf32>
    %c0_38 = arith.constant 0 : index
    %c4_39 = arith.constant 4 : index
    %c0_40 = arith.constant 0 : index
    %24 = vector.load %arg14[%c0_38, %c4_39, %c0_40] : memref<2x22x32xf32, #tpu.memory_space<vmem>>, vector<2x16x32xf32>
    %c0_41 = arith.constant 0 : index
    %c5_42 = arith.constant 5 : index
    %c0_43 = arith.constant 0 : index
    %25 = vector.load %arg14[%c0_41, %c5_42, %c0_43] : memref<2x22x32xf32, #tpu.memory_space<vmem>>, vector<2x16x32xf32>
    %c0_44 = arith.constant 0 : index
    %c6_45 = arith.constant 6 : index
    %c0_46 = arith.constant 0 : index
    %26 = vector.load %arg14[%c0_44, %c6_45, %c0_46] : memref<2x22x32xf32, #tpu.memory_space<vmem>>, vector<2x16x32xf32>
    %27 = tpu.concatenate %20, %21, %22, %23, %24, %25, %26 in 2 : vector<2x16x32xf32>, vector<2x16x32xf32>, vector<2x16x32xf32>, vector<2x16x32xf32>, vector<2x16x32xf32>, vector<2x16x32xf32>, vector<2x16x32xf32> -> vector<2x16x224xf32>
    %28 = vector.shape_cast %27 : vector<2x16x224xf32> to vector<32x224xf32>
    %c0_47 = arith.constant 0 : index
    %c0_48 = arith.constant 0 : index
    %29 = vector.load %arg3[%c0_47, %c0_48] : memref<224x32xf32, #tpu.memory_space<vmem>>, vector<224x32xf32>
    %cst_49 = arith.constant dense<0.000000e+00> : vector<32x32xf32>
    %30 = tpu.matmul %28, %29, %cst_49 {dimension_numbers = #tpu.dot_dimension_numbers<[1], [0], [0], [1], [0, 0, 1, 1], [], []>} : vector<32x224xf32>, vector<224x32xf32>, vector<32x32xf32> -> vector<32x32xf32>
    %c0_50 = arith.constant 0 : index
    %c0_51 = arith.constant 0 : index
    %31 = vector.load %arg4[%c0_50, %c0_51] : memref<1x32xf32, #tpu.memory_space<vmem>>, vector<1x32xf32>
    %32 = vector.broadcast %31 : vector<1x32xf32> to vector<32x32xf32>
    %33 = arith.addf %30, %32 : vector<32x32xf32>
    %cst_52 = arith.constant 0.000000e+00 : f32
    %34 = vector.broadcast %cst_52 : f32 to vector<32x32xf32>
    %35 = arith.maximumf %33, %34 : vector<32x32xf32>
    %36 = vector.shape_cast %35 : vector<32x32xf32> to vector<2x16x32xf32>
    %c0_53 = arith.constant 0 : index
    %c3_54 = arith.constant 3 : index
    %c0_55 = arith.constant 0 : index
    %37 = vector.load %arg14[%c0_53, %c3_54, %c0_55] : memref<2x22x32xf32, #tpu.memory_space<vmem>>, vector<2x16x32xf32>
    tpu.vector_store %arg14[%c0_53, %c3_54, %c0_55], %36 {strides = array<i32>} : memref<2x22x32xf32, #tpu.memory_space<vmem>>, vector<2x16x32xf32>,
    %c0_56 = arith.constant 0 : index
    %c0_57 = arith.constant 0 : index
    %c0_58 = arith.constant 0 : index
    %38 = vector.load %arg14[%c0_56, %c0_57, %c0_58] : memref<2x22x32xf32, #tpu.memory_space<vmem>>, vector<2x16x32xf32>
    %c0_59 = arith.constant 0 : index
    %c1_60 = arith.constant 1 : index
    %c0_61 = arith.constant 0 : index
    %39 = vector.load %arg14[%c0_59, %c1_60, %c0_61] : memref<2x22x32xf32, #tpu.memory_space<vmem>>, vector<2x16x32xf32>
    %c0_62 = arith.constant 0 : index
    %c2_63 = arith.constant 2 : index
    %c0_64 = arith.constant 0 : index
    %40 = vector.load %arg14[%c0_62, %c2_63, %c0_64] : memref<2x22x32xf32, #tpu.memory_space<vmem>>, vector<2x16x32xf32>
    %c0_65 = arith.constant 0 : index
    %c3_66 = arith.constant 3 : index
    %c0_67 = arith.constant 0 : index
    %41 = vector.load %arg14[%c0_65, %c3_66, %c0_67] : memref<2x22x32xf32, #tpu.memory_space<vmem>>, vector<2x16x32xf32>
    %c0_68 = arith.constant 0 : index
    %c4_69 = arith.constant 4 : index
    %c0_70 = arith.constant 0 : index
    %42 = vector.load %arg14[%c0_68, %c4_69, %c0_70] : memref<2x22x32xf32, #tpu.memory_space<vmem>>, vector<2x16x32xf32>
    %c0_71 = arith.constant 0 : index
    %c5_72 = arith.constant 5 : index
    %c0_73 = arith.constant 0 : index
    %43 = vector.load %arg14[%c0_71, %c5_72, %c0_73] : memref<2x22x32xf32, #tpu.memory_space<vmem>>, vector<2x16x32xf32>
    %c0_74 = arith.constant 0 : index
    %c6_75 = arith.constant 6 : index
    %c0_76 = arith.constant 0 : index
    %44 = vector.load %arg14[%c0_74, %c6_75, %c0_76] : memref<2x22x32xf32, #tpu.memory_space<vmem>>, vector<2x16x32xf32>
    %45 = tpu.concatenate %38, %39, %40, %41, %42, %43, %44 in 2 : vector<2x16x32xf32>, vector<2x16x32xf32>, vector<2x16x32xf32>, vector<2x16x32xf32>, vector<2x16x32xf32>, vector<2x16x32xf32>, vector<2x16x32xf32> -> vector<2x16x224xf32>
    %46 = vector.shape_cast %45 : vector<2x16x224xf32> to vector<32x224xf32>
    %c0_77 = arith.constant 0 : index
    %c0_78 = arith.constant 0 : index
    %47 = vector.load %arg5[%c0_77, %c0_78] : memref<224x32xf32, #tpu.memory_space<vmem>>, vector<224x32xf32>
    %cst_79 = arith.constant dense<0.000000e+00> : vector<32x32xf32>
    %48 = tpu.matmul %46, %47, %cst_79 {dimension_numbers = #tpu.dot_dimension_numbers<[1], [0], [0], [1], [0, 0, 1, 1], [], []>} : vector<32x224xf32>, vector<224x32xf32>, vector<32x32xf32> -> vector<32x32xf32>
    %c0_80 = arith.constant 0 : index
    %c0_81 = arith.constant 0 : index
    %49 = vector.load %arg6[%c0_80, %c0_81] : memref<1x32xf32, #tpu.memory_space<vmem>>, vector<1x32xf32>
    %50 = vector.broadcast %49 : vector<1x32xf32> to vector<32x32xf32>
    %51 = arith.addf %48, %50 : vector<32x32xf32>
    %52 = arith.addf %51, %15 : vector<32x32xf32>
    %cst_82 = arith.constant 0.000000e+00 : f32
    %53 = vector.broadcast %cst_82 : f32 to vector<32x32xf32>
    %54 = arith.maximumf %52, %53 : vector<32x32xf32>
    %55 = vector.shape_cast %54 : vector<32x32xf32> to vector<2x16x32xf32>
    %c0_83 = arith.constant 0 : index
    %c3_84 = arith.constant 3 : index
    %c0_85 = arith.constant 0 : index
    %56 = vector.load %arg14[%c0_83, %c3_84, %c0_85] : memref<2x22x32xf32, #tpu.memory_space<vmem>>, vector<2x16x32xf32>
    tpu.vector_store %arg14[%c0_83, %c3_84, %c0_85], %55 {strides = array<i32>} : memref<2x22x32xf32, #tpu.memory_space<vmem>>, vector<2x16x32xf32>,
    %c0_86 = arith.constant 0 : index
    %c0_87 = arith.constant 0 : index
    %c0_88 = arith.constant 0 : index
    %57 = vector.load %arg14[%c0_86, %c0_87, %c0_88] : memref<2x22x32xf32, #tpu.memory_space<vmem>>, vector<2x16x32xf32>
    %c0_89 = arith.constant 0 : index
    %c1_90 = arith.constant 1 : index
    %c0_91 = arith.constant 0 : index
    %58 = vector.load %arg14[%c0_89, %c1_90, %c0_91] : memref<2x22x32xf32, #tpu.memory_space<vmem>>, vector<2x16x32xf32>
    %c0_92 = arith.constant 0 : index
    %c2_93 = arith.constant 2 : index
    %c0_94 = arith.constant 0 : index
    %59 = vector.load %arg14[%c0_92, %c2_93, %c0_94] : memref<2x22x32xf32, #tpu.memory_space<vmem>>, vector<2x16x32xf32>
    %c0_95 = arith.constant 0 : index
    %c3_96 = arith.constant 3 : index
    %c0_97 = arith.constant 0 : index
    %60 = vector.load %arg14[%c0_95, %c3_96, %c0_97] : memref<2x22x32xf32, #tpu.memory_space<vmem>>, vector<2x16x32xf32>
    %c0_98 = arith.constant 0 : index
    %c4_99 = arith.constant 4 : index
    %c0_100 = arith.constant 0 : index
    %61 = vector.load %arg14[%c0_98, %c4_99, %c0_100] : memref<2x22x32xf32, #tpu.memory_space<vmem>>, vector<2x16x32xf32>
    %c0_101 = arith.constant 0 : index
    %c5_102 = arith.constant 5 : index
    %c0_103 = arith.constant 0 : index
    %62 = vector.load %arg14[%c0_101, %c5_102, %c0_103] : memref<2x22x32xf32, #tpu.memory_space<vmem>>, vector<2x16x32xf32>
    %c0_104 = arith.constant 0 : index
    %c6_105 = arith.constant 6 : index
    %c0_106 = arith.constant 0 : index
    %63 = vector.load %arg14[%c0_104, %c6_105, %c0_106] : memref<2x22x32xf32, #tpu.memory_space<vmem>>, vector<2x16x32xf32>
    %64 = tpu.concatenate %57, %58, %59, %60, %61, %62, %63 in 2 : vector<2x16x32xf32>, vector<2x16x32xf32>, vector<2x16x32xf32>, vector<2x16x32xf32>, vector<2x16x32xf32>, vector<2x16x32xf32>, vector<2x16x32xf32> -> vector<2x16x224xf32>
    %65 = vector.shape_cast %64 : vector<2x16x224xf32> to vector<32x224xf32>
    %c0_107 = arith.constant 0 : index
    %c0_108 = arith.constant 0 : index
    %66 = vector.load %arg7[%c0_107, %c0_108] : memref<224x32xf32, #tpu.memory_space<vmem>>, vector<224x32xf32>
    %cst_109 = arith.constant dense<0.000000e+00> : vector<32x32xf32>
    %67 = tpu.matmul %65, %66, %cst_109 {dimension_numbers = #tpu.dot_dimension_numbers<[1], [0], [0], [1], [0, 0, 1, 1], [], []>} : vector<32x224xf32>, vector<224x32xf32>, vector<32x32xf32> -> vector<32x32xf32>
    %c0_110 = arith.constant 0 : index
    %c0_111 = arith.constant 0 : index
    %68 = vector.load %arg8[%c0_110, %c0_111] : memref<1x32xf32, #tpu.memory_space<vmem>>, vector<1x32xf32>
    %69 = vector.broadcast %68 : vector<1x32xf32> to vector<32x32xf32>
    %70 = arith.addf %67, %69 : vector<32x32xf32>
    %cst_112 = arith.constant 0.000000e+00 : f32
    %71 = vector.broadcast %cst_112 : f32 to vector<32x32xf32>
    %72 = arith.maximumf %70, %71 : vector<32x32xf32>
    %73 = vector.shape_cast %72 : vector<32x32xf32> to vector<2x16x32xf32>
    %c0_113 = arith.constant 0 : index
    %c3_114 = arith.constant 3 : index
    %c0_115 = arith.constant 0 : index
    %74 = vector.load %arg14[%c0_113, %c3_114, %c0_115] : memref<2x22x32xf32, #tpu.memory_space<vmem>>, vector<2x16x32xf32>
    tpu.vector_store %arg14[%c0_113, %c3_114, %c0_115], %73 {strides = array<i32>} : memref<2x22x32xf32, #tpu.memory_space<vmem>>, vector<2x16x32xf32>,
    %c0_116 = arith.constant 0 : index
    %c0_117 = arith.constant 0 : index
    %c0_118 = arith.constant 0 : index
    %75 = vector.load %arg14[%c0_116, %c0_117, %c0_118] : memref<2x22x32xf32, #tpu.memory_space<vmem>>, vector<2x16x32xf32>
    %c0_119 = arith.constant 0 : index
    %c1_120 = arith.constant 1 : index
    %c0_121 = arith.constant 0 : index
    %76 = vector.load %arg14[%c0_119, %c1_120, %c0_121] : memref<2x22x32xf32, #tpu.memory_space<vmem>>, vector<2x16x32xf32>
    %c0_122 = arith.constant 0 : index
    %c2_123 = arith.constant 2 : index
    %c0_124 = arith.constant 0 : index
    %77 = vector.load %arg14[%c0_122, %c2_123, %c0_124] : memref<2x22x32xf32, #tpu.memory_space<vmem>>, vector<2x16x32xf32>
    %c0_125 = arith.constant 0 : index
    %c3_126 = arith.constant 3 : index
    %c0_127 = arith.constant 0 : index
    %78 = vector.load %arg14[%c0_125, %c3_126, %c0_127] : memref<2x22x32xf32, #tpu.memory_space<vmem>>, vector<2x16x32xf32>
    %c0_128 = arith.constant 0 : index
    %c4_129 = arith.constant 4 : index
    %c0_130 = arith.constant 0 : index
    %79 = vector.load %arg14[%c0_128, %c4_129, %c0_130] : memref<2x22x32xf32, #tpu.memory_space<vmem>>, vector<2x16x32xf32>
    %c0_131 = arith.constant 0 : index
    %c5_132 = arith.constant 5 : index
    %c0_133 = arith.constant 0 : index
    %80 = vector.load %arg14[%c0_131, %c5_132, %c0_133] : memref<2x22x32xf32, #tpu.memory_space<vmem>>, vector<2x16x32xf32>
    %c0_134 = arith.constant 0 : index
    %c6_135 = arith.constant 6 : index
    %c0_136 = arith.constant 0 : index
    %81 = vector.load %arg14[%c0_134, %c6_135, %c0_136] : memref<2x22x32xf32, #tpu.memory_space<vmem>>, vector<2x16x32xf32>
    %82 = tpu.concatenate %75, %76, %77, %78, %79, %80, %81 in 2 : vector<2x16x32xf32>, vector<2x16x32xf32>, vector<2x16x32xf32>, vector<2x16x32xf32>, vector<2x16x32xf32>, vector<2x16x32xf32>, vector<2x16x32xf32> -> vector<2x16x224xf32>
    %83 = vector.shape_cast %82 : vector<2x16x224xf32> to vector<32x224xf32>
    %c0_137 = arith.constant 0 : index
    %c0_138 = arith.constant 0 : index
    %84 = vector.load %arg9[%c0_137, %c0_138] : memref<224x32xf32, #tpu.memory_space<vmem>>, vector<224x32xf32>
    %cst_139 = arith.constant dense<0.000000e+00> : vector<32x32xf32>
    %85 = tpu.matmul %83, %84, %cst_139 {dimension_numbers = #tpu.dot_dimension_numbers<[1], [0], [0], [1], [0, 0, 1, 1], [], []>} : vector<32x224xf32>, vector<224x32xf32>, vector<32x32xf32> -> vector<32x32xf32>
    %c0_140 = arith.constant 0 : index
    %c0_141 = arith.constant 0 : index
    %86 = vector.load %arg10[%c0_140, %c0_141] : memref<1x32xf32, #tpu.memory_space<vmem>>, vector<1x32xf32>
    %87 = vector.broadcast %86 : vector<1x32xf32> to vector<32x32xf32>
    %88 = arith.addf %85, %87 : vector<32x32xf32>
    %89 = arith.addf %88, %54 : vector<32x32xf32>
    %cst_142 = arith.constant 0.000000e+00 : f32
    %90 = vector.broadcast %cst_142 : f32 to vector<32x32xf32>
    %91 = arith.maximumf %89, %90 : vector<32x32xf32>
    %92 = vector.shape_cast %91 : vector<32x32xf32> to vector<2x16x32xf32>
    %cst_143 = arith.constant dense<0xFF800000> : vector<2x32xf32>
    %93 = vector.multi_reduction <maximumf>, %92, %cst_143 [1] : vector<2x16x32xf32> to vector<2x32xf32>
    %c0_144 = arith.constant 0 : index
    %c0_145 = arith.constant 0 : index
    %94 = vector.load %arg11[%c0_144, %c0_145] : memref<32x4xf32, #tpu.memory_space<vmem>>, vector<32x4xf32>
    %cst_146 = arith.constant dense<0.000000e+00> : vector<2x4xf32>
    %95 = tpu.matmul %93, %94, %cst_146 {dimension_numbers = #tpu.dot_dimension_numbers<[1], [0], [0], [1], [0, 0, 1, 1], [], []>} : vector<2x32xf32>, vector<32x4xf32>, vector<2x4xf32> -> vector<2x4xf32>
    %c0_147 = arith.constant 0 : index
    %c0_148 = arith.constant 0 : index
    %96 = vector.load %arg12[%c0_147, %c0_148] : memref<1x4xf32, #tpu.memory_space<vmem>>, vector<1x4xf32>
    %97 = vector.broadcast %96 : vector<1x4xf32> to vector<2x4xf32>
    %98 = arith.addf %95, %97 : vector<2x4xf32>
    %c0_149 = arith.constant 0 : index
    %c0_150 = arith.constant 0 : index
    %99 = vector.load %arg13[%c0_149, %c0_150] : memref<2x4xf32, #tpu.memory_space<vmem>>, vector<2x4xf32>
    tpu.vector_store %arg13[%c0_149, %c0_150], %98 {strides = array<i32>} : memref<2x4xf32, #tpu.memory_space<vmem>>, vector<2x4xf32>,
    return
  }
}

</mosaic_0001>

<bundles_post_ra>
// kernel: restext_forward.1
= control target key start
LH: loop header
LB: loop body
LE: loop exit
PB: predicated region body
PF: predicated region fallthrough
CT: control target
= control target key end

     0   :  { %v1716_v5 = vmov 0.0   ;;  %vm153_vm0 = vcmask 261120   ;;  %s1717_s16 = smov 32   ;;  %s1718_s17 = smov 64   ;;  %s2756_s0 = inlined_call_operand.vmem [shape: f32[2,22,32], index: 0, kind: input, shape index: {}]   ;;  %s2757_s1 = inlined_call_operand.vmem [shape: f32[224,32], index: 1, kind: input, shape index: {}]   ;;  %s2758_s2 = inlined_call_operand.vmem [shape: f32[1,32], index: 2, kind: input, shape index: {}]   ;;  %s2759_s3 = inlined_call_operand.vmem [shape: f32[224,32], index: 3, kind: input, shape index: {}]   ;;  %s2760_s4 = inlined_call_operand.vmem [shape: f32[1,32], index: 4, kind: input, shape index: {}]   ;;  %s2761_s5 = inlined_call_operand.vmem [shape: f32[224,32], index: 5, kind: input, shape index: {}]   ;;  %s2762_s6 = inlined_call_operand.vmem [shape: f32[1,32], index: 6, kind: input, shape index: {}]   ;;  %s2763_s7 = inlined_call_operand.vmem [shape: f32[224,32], index: 7, kind: input, shape index: {}]   ;;  %s2764_s8 = inlined_call_operand.vmem [shape: f32[1,32], index: 8, kind: input, shape index: {}]   ;;  %s2765_s9 = inlined_call_operand.vmem [shape: f32[224,32], index: 9, kind: input, shape index: {}]   ;;  %s2766_s10 = inlined_call_operand.vmem [shape: f32[1,32], index: 10, kind: input, shape index: {}]   ;;  %s2767_s11 = inlined_call_operand.vmem [shape: f32[32,4], index: 11, kind: input, shape index: {}]   ;;  %s2768_s12 = inlined_call_operand.vmem [shape: f32[1,4], index: 12, kind: input, shape index: {}]   ;;  %s2769_s13 = inlined_call_operand.hbm [shape: f32[2,4], index: 13, kind: output, shape index: {}]  }
   0x1   :  { %v49_v0 = vld [vmem:[%s2756_s0 + $0x1] sm:$0xff]  ;;  %v50_v1 = vld [vmem:[%s2756_s0 + $0x9] sm:$0xff]  ;;  %223 = vmatprep.subr.mxu0 %v1716_v5  ;;  %498 = vmatprep.subr.mxu1 %v1716_v5  ;;  %312 = vst.msk [vmem:[#allocation2] sm:$0xff] %vm153_vm0, %v1716_v5  ;;  %313 = vst.msk [vmem:[#allocation2 + $0x8] sm:$0xff] %vm153_vm0, %v1716_v5  ;;  %s1719_s25 = smov 96  }
   0x2   :  { %v53_v2 = vld [vmem:[%s2756_s0 + $0x2] sm:$0xff]  ;;  %v1569_v3 = vpack.i.bf16 %v50_v1, %v49_v0  ;;  %v54_v4 = vld [vmem:[%s2756_s0 + $0xa] sm:$0xff]  ;;  %316 = vst.msk [vmem:[#allocation2 + $0x18] sm:$0xff] %vm153_vm0, %v1716_v5  ;;  %317 = vst.msk [vmem:[#allocation2 + $0x20] sm:$0xff] %vm153_vm0, %v1716_v5 }
   0x3   :  { %v1574_v6 = vpack.i.bf16 %v54_v4, %v53_v2  ;;  %v65_v7 = vld [vmem:[%s2756_s0 + $0x5] sm:$0xff]  ;;  %v191_v11 = vld [vmem:[%s2757_s1 + $0x78] sm:$0xff]  ;;  %v190_v13 = vld [vmem:[%s2757_s1 + $0x70] sm:$0xff] }
   0x4   :  { %1570 = vrot.lane.b32.xlu0 %v1569_v3, %s1717_s16  ;;  %v57_v8 = vld [vmem:[%s2756_s0 + $0x3] sm:$0xff]  ;;  %v58_v9 = vld [vmem:[%s2756_s0 + $0xb] sm:$0xff]  ;;  %224 = vmatpush1.msra.mxu0 %v191_v11  ;;  %v51_v16 = vld [vmem:[%s2756_s0 + $0x19] sm:$0xff] }
   0x5   :  { %1575 = vrot.lane.b32.xlu1 %v1574_v6, %s1718_s17  ;;  %v69_v10 = vld [vmem:[%s2756_s0 + $0x6] sm:$0xff]  ;;  %v1579_v12 = vpack.i.bf16 %v58_v9, %v57_v8  ;;  %225 = vmatprep.subr.mxu0 %v1716_v5  ;;  %v70_v19 = vld [vmem:[%s2756_s0 + $0xe] sm:$0xff]  ;;  %v187_v21 = vld [vmem:[%s2757_s1 + $0x58] sm:$0xff] }
   0x6   :  { %v189_v14 = vld [vmem:[%s2757_s1 + $0x68] sm:$0xff]  ;;  %226 = vmatpush1.msra.mxu0 %v190_v13  ;;  %v188_v18 = vld [vmem:[%s2757_s1 + $0x60] sm:$0xff]  ;;  %v186_v24 = vld [vmem:[%s2757_s1 + $0x50] sm:$0xff] }
   0x7   :  { %v66_v15 = vld [vmem:[%s2756_s0 + $0xd] sm:$0xff]  ;;  %v52_v17 = vld [vmem:[%s2756_s0 + $0x21] sm:$0xff]  ;;  %227 = vmatprep.subr.mxu0 %v1716_v5 }
   0x8   :  { %125 = vrot.lane.b32.xlu0 %v65_v7, %s1717_s16  ;;  %228 = vmatpush1.msra.mxu0 %v189_v14  ;;  %v1584_v20 = vpack.i.bf16 %v52_v17, %v51_v16  ;;  %v55_v22 = vld [vmem:[%s2756_s0 + $0x1a] sm:$0xff]  ;;  %v56_v23 = vld [vmem:[%s2756_s0 + $0x22] sm:$0xff] }
   0x9   :  { %141 = vrot.lane.b32.xlu1 %v69_v10, %s1718_s17  ;;  %229 = vmatprep.subr.mxu0 %v1716_v5  ;;  %v67_v25 = vld [vmem:[%s2756_s0 + $0x1d] sm:$0xff]  ;;  %v1589_v26 = vpack.i.bf16 %v56_v23, %v55_v22  ;;  %v185_v27 = vld [vmem:[%s2757_s1 + $0x48] sm:$0xff] }
   0xa   :  { %230 = vmatpush1.msra.mxu0 %v188_v18  ;;  %v184_v28 = vld [vmem:[%s2757_s1 + $0x40] sm:$0xff] }
   0xb   :  { %231 = vmatprep.subr.mxu0 %v1716_v5 }
   0xc   :  { %1580 = vrot.lane.b32.xlu0 %v1579_v12, %s1719_s25  ;;  %232 = vmatpush1.msra.mxu0 %v187_v21 }
   0xd   :  { %127 = vrot.lane.b32.xlu1 %v66_v15, %s1717_s16  ;;  %233 = vmatprep.subr.mxu0 %v1716_v5 }
   0xe   :  { %234 = vmatpush1.msra.mxu0 %v186_v24 }
   0xf   :  { %235 = vmatprep.subr.mxu0 %v1716_v5 }
  0x10   :  { %143 = vrot.lane.b32.xlu0 %v70_v19, %s1718_s17 }
  0x11   :  { %1585 = vrot.lane.b32.xlu1 %v1584_v20, %s1717_s16 }
  0x12   :  { %18 = vsyncpa [#allocation4], 0  ;;  %236 = vmatpush1.msra.mxu0 %v185_v27  ;;  %v71_v29 = vld [vmem:[%s2756_s0 + $0x1e] sm:$0xff]  ;;  %v182_v32 = vld [vmem:[%s2757_s1 + $0x30] sm:$0xff]  ;;  %vm163_vm1 = vcmask 785408   ;;  %vm158_vm2 = vcmask 523264  }
  0x13   :  { %237 = vmatprep.subr.mxu0 %v1716_v5  ;;  %v183_v30 = vld [vmem:[%s2757_s1 + $0x38] sm:$0xff]  ;;  %v68_v33 = vld [vmem:[%s2756_s0 + $0x25] sm:$0xff]  ;;  %v178_v39 = vld [vmem:[%s2757_s1 + $0x10] sm:$0xff]  ;;  %vm314_vm3 = vcmask 259072   ;;  %vm1720_vm4 = vmmov 0   ;;  %vm1430_vm5 = vcmask 1041409  }
  0x14   :  { %129 = vrot.lane.b32.xlu0 %v67_v25, %s1717_s16  ;;  %v59_v31 = vld [vmem:[%s2756_s0 + $0x1b] sm:$0xff]  ;;  %238 = vmatpush1.msra.mxu0 %v184_v28  ;;  %v181_v34 = vld [vmem:[%s2757_s1 + $0x28] sm:$0xff]  ;;  %v202_v43 = vld [vmem:[%s2757_s1 + $0xd0] sm:$0xff]  ;;  %315 = vst.msk [vmem:[#allocation2 + $0x10] sm:$0x3f] %vm314_vm3, %v1716_v5  ;;  %s1721_s27 = smov [#allocation3]  }
  0x15   :  { %1590 = vrot.lane.b32.xlu1 %v1589_v26, %s1718_s17  ;;  %239 = vmatprep.subr.mxu0 %v1716_v5  ;;  %v72_v35 = vld [vmem:[%s2756_s0 + $0x26] sm:$0xff]  ;;  %v179_v38 = vld [vmem:[%s2757_s1 + $0x18] sm:$0xff]  ;;  %v198_v47 = vld [vmem:[%s2757_s1 + $0xb0] sm:$0xff]  ;;  %318 = vst.msk [vmem:[#allocation2 + $0x28] sm:$0x3f] %vm314_vm3, %v1716_v5  ;;  %s1512_s28 = sshll.u32 %s1721_s27, 4  ;;  %s1513_s28 = int_to_ptr.vmem [resolvable:$true] %s1512_s28 }
  0x16   :  { %240 = vmatpush1.msra.mxu0 %v183_v30  ;;  %v180_v36 = vld [vmem:[%s2757_s1 + $0x20] sm:$0xff]  ;;  %v177_v40 = vld [vmem:[%s2757_s1 + $0x8] sm:$0xff]  ;;  %v203_v42 = vld [vmem:[%s2757_s1 + $0xd8] sm:$0xff]  ;;  %vm1504_vm6 = vcmask 25600   ;;  %s1694_s29 = scalar_lea.vmem %s1513_s28, 32  ;;  %p1699_p1 = scmp.lt.s32.totalorder %s1513_s28, %s1513_s28 }
  0x17   :  { %241 = vmatprep.subr.mxu0 %v1716_v5  ;;  %v60_v37 = vld [vmem:[%s2756_s0 + $0x23] sm:$0xff]  ;;  %v199_v46 = vld [vmem:[%s2757_s1 + $0xb8] sm:$0xff]  ;;  %v194_v51 = vld [vmem:[%s2757_s1 + $0x90] sm:$0xff]  ;;  %p1695_p0 = scmp.ne.s32.totalorder %s1513_s28, %s1694_s29  ;;  %p1700_p2 = scmp.lt.s32.totalorder %s1694_s29, %s1694_s29 }
  0x18   :  { %145 = vrot.lane.b32.xlu0 %v71_v29, %s1718_s17  ;;  %242 = vmatpush1.msra.mxu0 %v182_v32  ;;  %v176_v41 = vld [vmem:[%s2757_s1] sm:$0xff]  ;;  %v201_v44 = vld [vmem:[%s2757_s1 + $0xc8] sm:$0xff]  ;;  %v195_v50 = vld [vmem:[%s2757_s1 + $0x98] sm:$0xff] }
  0x19   :  { %113 = vrot.lane.b32.xlu1 %v59_v31, %s1719_s25  ;;  %243 = vmatprep.subr.mxu0 %v1716_v5  ;;  %v200_v45 = vld [vmem:[%s2757_s1 + $0xc0] sm:$0xff]  ;;  %v197_v48 = vld [vmem:[%s2757_s1 + $0xa8] sm:$0xff]  ;;  %v47_v19 = vld [vmem:[%s2756_s0 + $0x18] sm:$0xff]  ;;  %p1701_p3 = por %p1700_p2, %p1699_p1 }
  0x1a   :  { %244 = vmatpush1.msra.mxu0 %v181_v34  ;;  %v196_v49 = vld [vmem:[%s2757_s1 + $0xa0] sm:$0xff]  ;;  %v193_v52 = vld [vmem:[%s2757_s1 + $0x88] sm:$0xff] }
  0x1b   :  { %245 = vmatprep.subr.mxu0 %v1716_v5  ;;  %v192_v53 = vld [vmem:[%s2757_s1 + $0x80] sm:$0xff]  ;;  %v62_v1 = vld [vmem:[%s2756_s0 + $0xc] sm:$0xff]  ;;  %p1702_p4 = pnand %p1701_p3, %p1695_p0 }
  0x1c   :  { %131 = vrot.lane.b32.xlu0 %v68_v33, %s1717_s16  ;;  %246 = vmatpush1.msra.mxu0 %v180_v36  ;;  %v61_v56 = vld [vmem:[%s2756_s0 + $0x4] sm:$0xff]  ;;  %v63_v20 = vld [vmem:[%s2756_s0 + $0x1c] sm:$0xff] }
  0x1d   :  { %147 = vrot.lane.b32.xlu1 %v72_v35, %s1718_s17  ;;  %247 = vmatprep.subr.mxu0 %v1716_v5  ;;  %v45_v59 = vld [vmem:[%s2756_s0] sm:$0xff]  ;;  %v46_v4 = vld [vmem:[%s2756_s0 + $0x8] sm:$0xff] }
  0x1e   :  { %248 = vmatpush1.msra.mxu0 %v179_v38  ;;  %v48_v30 = vld [vmem:[%s2756_s0 + $0x20] sm:$0xff] }
  0x1f   :  { %249 = vmatprep.subr.mxu0 %v1716_v5  ;;  %v64_v34 = vld [vmem:[%s2756_s0 + $0x24] sm:$0xff] }
  0x20   :  { %115 = vrot.lane.b32.xlu0 %v60_v37, %s1719_s25  ;;  %250 = vmatpush1.msra.mxu0 %v178_v39 }
  0x21   :  { %251 = vmatprep.subr.mxu0 %v1716_v5 }
  0x22   :  { %252 = vmatpush1.msra.mxu0 %v177_v40 }
  0x23   :  { %253 = vmatprep.subr.mxu0 %v1716_v5 }
  0x24   :  { %254 = vmatpush1.msra.mxu0 %v176_v41 }
  0x25   :  { %263 = vmatprep.subr.mxu0 %v1716_v5 }
  0x26   :  { %264 = vmatpush2.msra.mxu0 %v203_v42 }
  0x27   :  { %265 = vmatprep.subr.mxu0 %v1716_v5 }
  0x28   :  { %266 = vmatpush2.msra.mxu0 %v202_v43 }
  0x29   :  { %267 = vmatprep.subr.mxu0 %v1716_v5 }
  0x2a   :  { %268 = vmatpush2.msra.mxu0 %v201_v44  ;;  %v466_v44 = vld [vmem:[%s2759_s3 + $0x78] sm:$0xff] }
  0x2b   :  { %269 = vmatprep.subr.mxu0 %v1716_v5  ;;  %499 = vmatpush1.msra.mxu1 %v466_v44 }
  0x2c   :  { %270 = vmatpush2.msra.mxu0 %v200_v45  ;;  %v465_v45 = vld [vmem:[%s2759_s3 + $0x70] sm:$0xff]  ;;  %500 = vmatprep.subr.mxu1 %v1716_v5 }
  0x2d   :  { %271 = vmatprep.subr.mxu0 %v1716_v5  ;;  %501 = vmatpush1.msra.mxu1 %v465_v45 }
  0x2e   :  { %272 = vmatpush2.msra.mxu0 %v199_v46  ;;  %v464_v46 = vld [vmem:[%s2759_s3 + $0x68] sm:$0xff]  ;;  %502 = vmatprep.subr.mxu1 %v1716_v5 }
  0x2f   :  { %273 = vmatprep.subr.mxu0 %v1716_v5  ;;  %503 = vmatpush1.msra.mxu1 %v464_v46 }
  0x30   :  { %274 = vmatpush2.msra.mxu0 %v198_v47  ;;  %v463_v47 = vld [vmem:[%s2759_s3 + $0x60] sm:$0xff]  ;;  %504 = vmatprep.subr.mxu1 %v1716_v5 }
  0x31   :  { %275 = vmatprep.subr.mxu0 %v1716_v5  ;;  %505 = vmatpush1.msra.mxu1 %v463_v47 }
  0x32   :  { %276 = vmatpush2.msra.mxu0 %v197_v48  ;;  %v462_v48 = vld [vmem:[%s2759_s3 + $0x58] sm:$0xff]  ;;  %506 = vmatprep.subr.mxu1 %v1716_v5 }
  0x33   :  { %277 = vmatprep.subr.mxu0 %v1716_v5  ;;  %507 = vmatpush1.msra.mxu1 %v462_v48 }
  0x34   :  { %278 = vmatpush2.msra.mxu0 %v196_v49  ;;  %v461_v49 = vld [vmem:[%s2759_s3 + $0x50] sm:$0xff]  ;;  %508 = vmatprep.subr.mxu1 %v1716_v5 }
  0x35   :  { %279 = vmatprep.subr.mxu0 %v1716_v5  ;;  %509 = vmatpush1.msra.mxu1 %v461_v49 }
  0x36   :  { %280 = vmatpush2.msra.mxu0 %v195_v50  ;;  %v460_v50 = vld [vmem:[%s2759_s3 + $0x48] sm:$0xff]  ;;  %510 = vmatprep.subr.mxu1 %v1716_v5 }
  0x37   :  { %281 = vmatprep.subr.mxu0 %v1716_v5  ;;  %511 = vmatpush1.msra.mxu1 %v460_v50 }
  0x38   :  { %282 = vmatpush2.msra.mxu0 %v194_v51  ;;  %v459_v51 = vld [vmem:[%s2759_s3 + $0x40] sm:$0xff]  ;;  %512 = vmatprep.subr.mxu1 %v1716_v5 }
  0x39   :  { %283 = vmatprep.subr.mxu0 %v1716_v5  ;;  %513 = vmatpush1.msra.mxu1 %v459_v51 }
  0x3a   :  { %284 = vmatpush2.msra.mxu0 %v193_v52  ;;  %v458_v52 = vld [vmem:[%s2759_s3 + $0x38] sm:$0xff]  ;;  %514 = vmatprep.subr.mxu1 %v1716_v5 }
  0x3b   :  { %285 = vmatprep.subr.mxu0 %v1716_v5  ;;  %515 = vmatpush1.msra.mxu1 %v458_v52 }
  0x3c   :  { %286 = vmatpush2.msra.mxu0 %v192_v53  ;;  %v457_v53 = vld [vmem:[%s2759_s3 + $0x30] sm:$0xff]  ;;  %516 = vmatprep.subr.mxu1 %v1716_v5 }
  0x3d   :  { %766 = vmatprep.subr.mxu0 %v1716_v5  ;;  %517 = vmatpush1.msra.mxu1 %v457_v53 }
  0x3e   :  { %518 = vmatprep.subr.mxu1 %v1716_v5 }
  0x76   :  { %v1571_v54 = vpop.permute.xlu0 %1570 }
  0x77   :  { %v1576_v55 = vpop.permute.xlu1 %1575  ;;  %v1572_v57 = vunpack.i.l.bf16 %v1571_v54  ;;  %v1573_v0 = vunpack.i.h.bf16 %v1571_v54  ;;  %v456_v54 = vld [vmem:[%s2759_s3 + $0x28] sm:$0xff] }
  0x78   :  { %v1577_v62 = vunpack.i.l.bf16 %v1576_v55  ;;  %v1578_v8 = vunpack.i.h.bf16 %v1576_v55  ;;  %v455_v55 = vld [vmem:[%s2759_s3 + $0x20] sm:$0xff]  ;;  %519 = vmatpush1.msra.mxu1 %v456_v54 }
  0x79   :  { %v154_v2 = vsel %vm153_vm0, %v45_v59, %v1572_v57  ;;  %v155_v13 = vsel %vm153_vm0, %v46_v4, %v1573_v0  ;;  %520 = vmatprep.subr.mxu1 %v1716_v5  ;;  %v453_v57 = vld [vmem:[%s2759_s3 + $0x10] sm:$0xff]  ;;  %v451_v59 = vld [vmem:[%s2759_s3] sm:$0xff]  ;;  %v474_v0 = vld [vmem:[%s2759_s3 + $0xb8] sm:$0xff] }
  0x7a   :  { %v126_v58 = vpop.permute.xlu0 %125  ;;  %v159_v10 = vsel %vm158_vm2, %v154_v2, %v1577_v62  ;;  %v160_v18 = vsel %vm158_vm2, %v155_v13, %v1578_v8  ;;  %521 = vmatpush1.msra.mxu1 %v455_v55  ;;  %v476_v62 = vld [vmem:[%s2759_s3 + $0xc8] sm:$0xff]  ;;  %v473_v8 = vld [vmem:[%s2759_s3 + $0xb0] sm:$0xff]  ;;  %v471_v13 = vld [vmem:[%s2759_s3 + $0xa0] sm:$0xff] }
  0x7b   :  { %v168_v60 = vsel %vm153_vm0, %v61_v56, %v126_v58  ;;  %v142_v61 = vpop.permute.xlu1 %141  ;;  %v454_v56 = vld [vmem:[%s2759_s3 + $0x18] sm:$0xff]  ;;  %522 = vmatprep.subr.mxu1 %v1716_v5  ;;  %v452_v58 = vld [vmem:[%s2759_s3 + $0x8] sm:$0xff] }
  0x7c   :  { %v172_v63 = vsel %vm158_vm2, %v168_v60, %v142_v61  ;;  %523 = vmatpush1.msra.mxu1 %v454_v56  ;;  %v478_v60 = vld [vmem:[%s2759_s3 + $0xd8] sm:$0xff]  ;;  %v477_v61 = vld [vmem:[%s2759_s3 + $0xd0] sm:$0xff] }
  0x7d   :  { %1521 = vmatprep.mubr.msk.f32.mxu0 %vm163_vm1, %v172_v63  ;;  %524 = vmatprep.subr.mxu1 %v1716_v5  ;;  %v475_v63 = vld [vmem:[%s2759_s3 + $0xc0] sm:$0xff] }
  0x7e   :  { %v1581_v3 = vpop.permute.xlu0 %1580  ;;  %525 = vmatpush1.msra.mxu1 %v453_v57 }
  0x7f   :  { %v1582_v6 = vunpack.i.l.bf16 %v1581_v3  ;;  %v128_v7 = vpop.permute.xlu1 %127  ;;  %v1583_v11 = vunpack.i.h.bf16 %v1581_v3  ;;  %526 = vmatprep.subr.mxu1 %v1716_v5 }
  0x80   :  { %v169_v9 = vsel %vm153_vm0, %v62_v1, %v128_v7  ;;  %527 = vmatpush1.msra.mxu1 %v452_v58  ;;  %v1520_v1 = vld [vmem:[%s2758_s2] ss:$0 sm:$0xff] }
  0x81   :  { %v164_v12 = vsel %vm163_vm1, %v159_v10, %v1582_v6  ;;  %v165_v21 = vsel %vm163_vm1, %v160_v18, %v1583_v11  ;;  %528 = vmatprep.subr.mxu1 %v1716_v5  ;;  %v472_v11 = vld [vmem:[%s2759_s3 + $0xa8] sm:$0xff]  ;;  %v469_v18 = vld [vmem:[%s2759_s3 + $0x90] sm:$0xff] }
  0x82   :  { %v144_v14 = vpop.permute.xlu0 %143  ;;  %288 = vmatmul.mubr.f32.vlgmr.msra.gmra.mxu0 %v164_v12  ;;  %529 = vmatpush1.msra.mxu1 %v451_v59 }
  0x83   :  { %v173_v15 = vsel %vm158_vm2, %v169_v9, %v144_v14  ;;  %v1586_v16 = vpop.permute.xlu1 %1585  ;;  %538 = vmatprep.subr.mxu1 %v1716_v5  ;;  %v470_v14 = vld [vmem:[%s2759_s3 + $0x98] sm:$0xff] }
  0x84   :  { %v1587_v17 = vunpack.i.l.bf16 %v1586_v16  ;;  %1522 = vmatprep.mubr.msk.f32.mxu0 %vm163_vm1, %v173_v15  ;;  %v1588_v27 = vunpack.i.h.bf16 %v1586_v16  ;;  %539 = vmatpush2.msra.mxu1 %v478_v60 }
  0x85   :  { %540 = vmatprep.subr.mxu1 %v1716_v5 }
  0x86   :  { %v130_v22 = vpop.permute.xlu0 %129  ;;  %293 = vmatmul.mubr.f32.gmra.mxu0 %v165_v21  ;;  %v156_v24 = vsel %vm153_vm0, %v47_v19, %v1587_v17  ;;  %v157_v36 = vsel %vm153_vm0, %v48_v30, %v1588_v27  ;;  %541 = vmatpush2.msra.mxu1 %v477_v61  ;;  %v467_v21 = vld [vmem:[%s2759_s3 + $0x80] sm:$0xff] }
  0x87   :  { %v1591_v23 = vpop.permute.xlu1 %1590  ;;  %v170_v25 = vsel %vm153_vm0, %v63_v20, %v130_v22  ;;  %542 = vmatprep.subr.mxu1 %v1716_v5  ;;  %v468_v20 = vld [vmem:[%s2759_s3 + $0x88] sm:$0xff] }
  0x88   :  { %v1592_v26 = vunpack.i.l.bf16 %v1591_v23  ;;  %v1593_v33 = vunpack.i.h.bf16 %v1591_v23  ;;  %543 = vmatpush2.msra.mxu1 %v476_v62 }
  0x89   :  { %544 = vmatprep.subr.mxu1 %v1716_v5 }
  0x8a   :  { %v146_v28 = vpop.permute.xlu0 %145  ;;  %v161_v29 = vsel %vm158_vm2, %v156_v24, %v1592_v26  ;;  %v162_v41 = vsel %vm158_vm2, %v157_v36, %v1593_v33  ;;  %545 = vmatpush2.msra.mxu1 %v475_v63 }
  0x8b   :  { %v174_v31 = vsel %vm158_vm2, %v170_v25, %v146_v28  ;;  %v114_v32 = vpop.permute.xlu1 %113  ;;  %546 = vmatprep.subr.mxu1 %v1716_v5 }
  0x8c   :  { %1523 = vmatprep.mubr.msk.f32.mxu0 %vm163_vm1, %v174_v31  ;;  %v166_v35 = vsel %vm163_vm1, %v161_v29, %v114_v32  ;;  %547 = vmatpush2.msra.mxu1 %v474_v0 }
  0x8d   :  { %298 = vmatmul.mubr.f32.gmra.mxu0 %v166_v35  ;;  %548 = vmatprep.subr.mxu1 %v1716_v5 }
  0x8e   :  { %v132_v37 = vpop.permute.xlu0 %131  ;;  %549 = vmatpush2.msra.mxu1 %v473_v8 }
  0x8f   :  { %v171_v38 = vsel %vm153_vm0, %v64_v34, %v132_v37  ;;  %v148_v39 = vpop.permute.xlu1 %147  ;;  %550 = vmatprep.subr.mxu1 %v1716_v5 }
  0x90   :  { %v175_v40 = vsel %vm158_vm2, %v171_v38, %v148_v39  ;;  %551 = vmatpush2.msra.mxu1 %v472_v11 }
  0x91   :  { %1524 = vmatprep.mubr.msk.f32.mxu0 %vm163_vm1, %v175_v40  ;;  %552 = vmatprep.subr.mxu1 %v1716_v5 }
  0x92   :  { %v116_v42 = vpop.permute.xlu0 %115  ;;  %553 = vmatpush2.msra.mxu1 %v471_v13 }
  0x93   :  { %v167_v43 = vsel %vm163_vm1, %v162_v41, %v116_v42  ;;  %554 = vmatprep.subr.mxu1 %v1716_v5 }
  0x94   :  { %303 = vmatmul.mubr.f32.gmra.mxu0 %v167_v43  ;;  %555 = vmatpush2.msra.mxu1 %v470_v14 }
  0x95   :  { %556 = vmatprep.subr.mxu1 %v1716_v5 }
  0x96   :  { %557 = vmatpush2.msra.mxu1 %v469_v18 }
  0x97   :  { %558 = vmatprep.subr.mxu1 %v1716_v5 }
  0x98   :  { %559 = vmatpush2.msra.mxu1 %v468_v20 }
  0x99   :  { %560 = vmatprep.subr.mxu1 %v1716_v5 }
  0x9a   :  { %561 = vmatpush2.msra.mxu1 %v467_v21 }
  0x9b   :  { %1038 = vmatprep.subr.mxu1 %v1716_v5 }
 0x142   :  { %v289_v2 = vpop.f32.mrf.mxu0 }
 0x143   :  { %v2126_v3 = vadd.f32 %v1520_v1, %v289_v2 }
 0x144   :  { %v291_v4 = vpop.f32.mrf.mxu0 }
 0x145   :  { %v308_v6 = vmax.f32 %v2126_v3, 0.0 }
 0x146   :  { %v294_v7 = vpop.f32.mrf.mxu0 }
 0x147   :  { %319 = vst.msk [vmem:[#allocation2 + $0x3] sm:$0xff] %vm153_vm0, %v308_v6  ;;  %v2135_v9 = vadd.f32 %v1520_v1, %v294_v7 }
 0x148   :  { %v296_v10 = vpop.f32.mrf.mxu0 }
 0x149   :  { %v309_v12 = vmax.f32 %v2135_v9, 0.0 }
 0x14b   :  { %320 = vst.msk [vmem:[#allocation2 + $0xb] sm:$0xff] %vm153_vm0, %v309_v12 }
 0x14d   :  { %v299_v15 = vpop.f32.mrf.mxu0 }
 0x14e   :  { %v2153_v16 = vadd.f32 %v1520_v1, %v299_v15  ;;  %v327_v23 = vld [vmem:[#allocation2 + $0x1] sm:$0xff] }
 0x14f   :  { %v301_v17 = vpop.f32.mrf.mxu0  ;;  %v331_v31 = vld [vmem:[#allocation2 + $0x2] sm:$0xff] }
 0x150   :  { %v310_v19 = vmax.f32 %v2153_v16, 0.0  ;;  %v335_v36 = vld [vmem:[#allocation2 + $0x3] sm:$0xff] }
 0x151   :  { %v323_v62 = vld [vmem:[#allocation2] sm:$0xff]  ;;  %v1008_v16 = vld [vmem:[%s2763_s7 + $0x88] sm:$0xff] }
 0x152   :  { %321 = vst.msk [vmem:[#allocation2 + $0x1b] sm:$0xff] %vm153_vm0, %v310_v19  ;;  %v343_v22 = vld [vmem:[#allocation2 + $0x5] sm:$0xff]  ;;  %v344_v35 = vld [vmem:[#allocation2 + $0xd] sm:$0xff] }
 0x153   :  { %v328_v24 = vld [vmem:[#allocation2 + $0x9] sm:$0xff]  ;;  %403 = vrot.lane.b32.xlu0 %v343_v22, %s1717_s16 }
 0x154   :  { %v1594_v25 = vpack.i.bf16 %v328_v24, %v327_v23  ;;  %v304_v26 = vpop.f32.mrf.mxu0  ;;  %v332_v27 = vld [vmem:[#allocation2 + $0xa] sm:$0xff] }
 0x155   :  { %v2172_v28 = vadd.f32 %v1520_v1, %v304_v26  ;;  %v347_v30 = vld [vmem:[#allocation2 + $0x6] sm:$0xff]  ;;  %v1599_v33 = vpack.i.bf16 %v332_v27, %v331_v31  ;;  %v348_v40 = vld [vmem:[#allocation2 + $0xe] sm:$0xff] }
 0x156   :  { %1595 = vrot.lane.b32.xlu1 %v1594_v25, %s1717_s16  ;;  %v306_v29 = vpop.f32.mrf.mxu0  ;;  %v336_v34 = vld [vmem:[#allocation2 + $0xb] sm:$0xff] }
 0x157   :  { %v311_v32 = vmax.f32 %v2172_v28, 0.0  ;;  %419 = vrot.lane.b32.xlu0 %v347_v30, %s1718_s17  ;;  %v1604_v37 = vpack.i.bf16 %v336_v34, %v335_v36  ;;  %v339_v53 = vld [vmem:[#allocation2 + $0x4] sm:$0xff]  ;;  %v340_v8 = vld [vmem:[#allocation2 + $0xc] sm:$0xff] }
 0x158   :  { %v324_v15 = vld [vmem:[#allocation2 + $0x8] sm:$0xff] }
 0x159   :  { %322 = vst.msk [vmem:[#allocation2 + $0x23] sm:$0xff] %vm153_vm0, %v311_v32  ;;  %v337_v38 = vld [vmem:[#allocation2 + $0x1b] sm:$0xff] }
 0x15a   :  { %1600 = vrot.lane.b32.xlu1 %v1599_v33, %s1718_s17  ;;  %v329_v39 = vld [vmem:[#allocation2 + $0x19] sm:$0xff] }
 0x15b   :  { %405 = vrot.lane.b32.xlu0 %v344_v35, %s1717_s16  ;;  %v333_v42 = vld [vmem:[#allocation2 + $0x1a] sm:$0xff] }
 0x15c   :  { %v325_v29 = vld [vmem:[#allocation2 + $0x18] sm:$0xff] }
 0x15e   :  { %1605 = vrot.lane.b32.xlu1 %v1604_v37, %s1719_s25 }
 0x15f   :  { %391 = vrot.lane.b32.xlu0 %v337_v38, %s1719_s25 }
 0x160   :  { %v330_v41 = vld [vmem:[#allocation2 + $0x21] sm:$0xff] }
 0x161   :  { %v334_v43 = vld [vmem:[#allocation2 + $0x22] sm:$0xff]  ;;  %v1609_v44 = vpack.i.bf16 %v330_v41, %v329_v39 }
 0x162   :  { %421 = vrot.lane.b32.xlu1 %v348_v40, %s1718_s17  ;;  %v345_v45 = vld [vmem:[#allocation2 + $0x1d] sm:$0xff]  ;;  %v1614_v46 = vpack.i.bf16 %v334_v43, %v333_v42  ;;  %v350_v48 = vld [vmem:[#allocation2 + $0x26] sm:$0xff] }
 0x163   :  { %1610 = vrot.lane.b32.xlu0 %v1609_v44, %s1717_s16  ;;  %v349_v47 = vld [vmem:[#allocation2 + $0x1e] sm:$0xff] }
 0x164   :  { %v346_v49 = vld [vmem:[#allocation2 + $0x25] sm:$0xff]  ;;  %v341_v26 = vld [vmem:[#allocation2 + $0x1c] sm:$0xff] }
 0x165   :  { %v338_v50 = vld [vmem:[#allocation2 + $0x23] sm:$0xff] }
 0x166   :  { %407 = vrot.lane.b32.xlu1 %v345_v45, %s1717_s16  ;;  %v342_v39 = vld [vmem:[#allocation2 + $0x24] sm:$0xff] }
 0x167   :  { %1615 = vrot.lane.b32.xlu0 %v1614_v46, %s1718_s17  ;;  %v326_v44 = vld [vmem:[#allocation2 + $0x20] sm:$0xff] }
 0x16a   :  { %423 = vrot.lane.b32.xlu1 %v349_v47, %s1718_s17 }
 0x16b   :  { %425 = vrot.lane.b32.xlu0 %v350_v48, %s1718_s17 }
 0x16e   :  { %409 = vrot.lane.b32.xlu1 %v346_v49, %s1717_s16  ;;  %v734_v49 = vld [vmem:[%s2761_s5 + $0x78] sm:$0xff] }
 0x16f   :  { %767 = vmatpush1.msra.mxu0 %v734_v49 }
 0x170   :  { %768 = vmatprep.subr.mxu0 %v1716_v5 }
 0x172   :  { %393 = vrot.lane.b32.xlu1 %v338_v50, %s1719_s25  ;;  %v733_v50 = vld [vmem:[%s2761_s5 + $0x70] sm:$0xff] }
 0x173   :  { %769 = vmatpush1.msra.mxu0 %v733_v50 }
 0x174   :  { %770 = vmatprep.subr.mxu0 %v1716_v5 }
 0x1c5   :  { %v404_v51 = vpop.permute.xlu0 %403 }
 0x1c6   :  { %v443_v54 = vsel %vm153_vm0, %v339_v53, %v404_v51  ;;  %v732_v51 = vld [vmem:[%s2761_s5 + $0x68] sm:$0xff]  ;;  %v730_v53 = vld [vmem:[%s2761_s5 + $0x58] sm:$0xff] }
 0x1c7   :  { %771 = vmatpush1.msra.mxu0 %v732_v51 }
 0x1c8   :  { %v1596_v52 = vpop.permute.xlu1 %1595  ;;  %772 = vmatprep.subr.mxu0 %v1716_v5 }
 0x1c9   :  { %v420_v55 = vpop.permute.xlu0 %419  ;;  %v1597_v58 = vunpack.i.l.bf16 %v1596_v52  ;;  %v1598_v63 = vunpack.i.h.bf16 %v1596_v52  ;;  %v731_v52 = vld [vmem:[%s2761_s5 + $0x60] sm:$0xff] }
 0x1ca   :  { %v447_v56 = vsel %vm158_vm2, %v443_v54, %v420_v55  ;;  %773 = vmatpush1.msra.mxu0 %v731_v52  ;;  %v729_v54 = vld [vmem:[%s2761_s5 + $0x50] sm:$0xff]  ;;  %v728_v55 = vld [vmem:[%s2761_s5 + $0x48] sm:$0xff] }
 0x1cb   :  { %1526 = vmatprep.mubr.msk.f32.mxu1 %vm163_vm1, %v447_v56  ;;  %v431_v1 = vsel %vm153_vm0, %v323_v62, %v1597_v58  ;;  %v432_v18 = vsel %vm153_vm0, %v324_v15, %v1598_v63  ;;  %774 = vmatprep.subr.mxu0 %v1716_v5  ;;  %v727_v56 = vld [vmem:[%s2761_s5 + $0x40] sm:$0xff]  ;;  %v725_v58 = vld [vmem:[%s2761_s5 + $0x30] sm:$0xff]  ;;  %v720_v63 = vld [vmem:[%s2761_s5 + $0x8] sm:$0xff] }
 0x1cc   :  { %v1601_v57 = vpop.permute.xlu1 %1600  ;;  %775 = vmatpush1.msra.mxu0 %v730_v53  ;;  %v721_v62 = vld [vmem:[%s2761_s5 + $0x10] sm:$0xff] }
 0x1cd   :  { %v1602_v59 = vunpack.i.l.bf16 %v1601_v57  ;;  %v406_v60 = vpop.permute.xlu0 %405  ;;  %v1603_v2 = vunpack.i.h.bf16 %v1601_v57  ;;  %776 = vmatprep.subr.mxu0 %v1716_v5  ;;  %v726_v57 = vld [vmem:[%s2761_s5 + $0x38] sm:$0xff] }
 0x1ce   :  { %v444_v13 = vsel %vm153_vm0, %v340_v8, %v406_v60  ;;  %777 = vmatpush1.msra.mxu0 %v729_v54  ;;  %v723_v60 = vld [vmem:[%s2761_s5 + $0x20] sm:$0xff]  ;;  %v742_v8 = vld [vmem:[%s2761_s5 + $0xb8] sm:$0xff] }
 0x1cf   :  { %v435_v7 = vsel %vm158_vm2, %v431_v1, %v1602_v59  ;;  %v436_v21 = vsel %vm158_vm2, %v432_v18, %v1603_v2  ;;  %778 = vmatprep.subr.mxu0 %v1716_v5  ;;  %v724_v59 = vld [vmem:[%s2761_s5 + $0x28] sm:$0xff]  ;;  %v746_v1 = vld [vmem:[%s2761_s5 + $0xd8] sm:$0xff]  ;;  %v745_v2 = vld [vmem:[%s2761_s5 + $0xd0] sm:$0xff] }
 0x1d0   :  { %v1606_v61 = vpop.permute.xlu1 %1605  ;;  %779 = vmatpush1.msra.mxu0 %v728_v55  ;;  %v741_v18 = vld [vmem:[%s2761_s5 + $0xb0] sm:$0xff] }
 0x1d1   :  { %v1607_v0 = vunpack.i.l.bf16 %v1606_v61  ;;  %v392_v4 = vpop.permute.xlu0 %391  ;;  %v1608_v10 = vunpack.i.h.bf16 %v1606_v61  ;;  %780 = vmatprep.subr.mxu0 %v1716_v5  ;;  %v722_v61 = vld [vmem:[%s2761_s5 + $0x18] sm:$0xff] }
 0x1d2   :  { %781 = vmatpush1.msra.mxu0 %v727_v56 }
 0x1d3   :  { %v439_v11 = vsel %vm163_vm1, %v435_v7, %v1607_v0  ;;  %v440_v22 = vsel %vm163_vm1, %v436_v21, %v1608_v10  ;;  %782 = vmatprep.subr.mxu0 %v1716_v5  ;;  %v719_v0 = vld [vmem:[%s2761_s5] sm:$0xff] }
 0x1d4   :  { %v422_v14 = vpop.permute.xlu1 %421  ;;  %563 = vmatmul.mubr.f32.vlgmr.msra.gmra.mxu1 %v439_v11  ;;  %783 = vmatpush1.msra.mxu0 %v726_v57  ;;  %v743_v7 = vld [vmem:[%s2761_s5 + $0xc0] sm:$0xff] }
 0x1d5   :  { %v448_v17 = vsel %vm158_vm2, %v444_v13, %v422_v14  ;;  %v1611_v20 = vpop.permute.xlu0 %1610  ;;  %784 = vmatprep.subr.mxu0 %v1716_v5  ;;  %v1525_v10 = vld [vmem:[%s2760_s4] ss:$0 sm:$0xff] }
 0x1d6   :  { %1527 = vmatprep.mubr.msk.f32.mxu1 %vm163_vm1, %v448_v17  ;;  %v1612_v23 = vunpack.i.l.bf16 %v1611_v20  ;;  %v1613_v37 = vunpack.i.h.bf16 %v1611_v20  ;;  %785 = vmatpush1.msra.mxu0 %v725_v58 }
 0x1d7   :  { %786 = vmatprep.subr.mxu0 %v1716_v5 }
 0x1d8   :  { %v408_v24 = vpop.permute.xlu1 %407  ;;  %568 = vmatmul.mubr.f32.gmra.mxu1 %v440_v22  ;;  %v433_v33 = vsel %vm153_vm0, %v325_v29, %v1612_v23  ;;  %v434_v45 = vsel %vm153_vm0, %v326_v44, %v1613_v37  ;;  %787 = vmatpush1.msra.mxu0 %v724_v59  ;;  %v740_v23 = vld [vmem:[%s2761_s5 + $0xa8] sm:$0xff]  ;;  %v738_v29 = vld [vmem:[%s2761_s5 + $0x98] sm:$0xff] }
 0x1d9   :  { %v1616_v25 = vpop.permute.xlu0 %1615  ;;  %v445_v30 = vsel %vm153_vm0, %v341_v26, %v408_v24  ;;  %788 = vmatprep.subr.mxu0 %v1716_v5  ;;  %v739_v24 = vld [vmem:[%s2761_s5 + $0xa0] sm:$0xff] }
 0x1da   :  { %v1617_v27 = vunpack.i.l.bf16 %v1616_v25  ;;  %v1618_v38 = vunpack.i.h.bf16 %v1616_v25  ;;  %789 = vmatpush1.msra.mxu0 %v723_v60 }
 0x1db   :  { %790 = vmatprep.subr.mxu0 %v1716_v5 }
 0x1dc   :  { %v424_v31 = vpop.permute.xlu1 %423  ;;  %v437_v35 = vsel %vm158_vm2, %v433_v33, %v1617_v27  ;;  %v438_v47 = vsel %vm158_vm2, %v434_v45, %v1618_v38  ;;  %791 = vmatpush1.msra.mxu0 %v722_v61  ;;  %v736_v33 = vld [vmem:[%s2761_s5 + $0x88] sm:$0xff]  ;;  %v735_v38 = vld [vmem:[%s2761_s5 + $0x80] sm:$0xff] }
 0x1dd   :  { %v449_v34 = vsel %vm158_vm2, %v445_v30, %v424_v31  ;;  %v441_v36 = vsel %vm163_vm1, %v437_v35, %v392_v4  ;;  %v426_v41 = vpop.permute.xlu0 %425  ;;  %792 = vmatprep.subr.mxu0 %v1716_v5  ;;  %v744_v4 = vld [vmem:[%s2761_s5 + $0xc8] sm:$0xff]  ;;  %v737_v30 = vld [vmem:[%s2761_s5 + $0x90] sm:$0xff] }
 0x1de   :  { %1528 = vmatprep.mubr.msk.f32.mxu1 %vm163_vm1, %v449_v34  ;;  %793 = vmatpush1.msra.mxu0 %v721_v62 }
 0x1df   :  { %573 = vmatmul.mubr.f32.gmra.mxu1 %v441_v36  ;;  %794 = vmatprep.subr.mxu0 %v1716_v5 }
 0x1e0   :  { %v410_v40 = vpop.permute.xlu1 %409  ;;  %795 = vmatpush1.msra.mxu0 %v720_v63 }
 0x1e1   :  { %v446_v42 = vsel %vm153_vm0, %v342_v39, %v410_v40  ;;  %796 = vmatprep.subr.mxu0 %v1716_v5 }
 0x1e2   :  { %v450_v43 = vsel %vm158_vm2, %v446_v42, %v426_v41  ;;  %797 = vmatpush1.msra.mxu0 %v719_v0 }
 0x1e3   :  { %1529 = vmatprep.mubr.msk.f32.mxu1 %vm163_vm1, %v450_v43  ;;  %806 = vmatprep.subr.mxu0 %v1716_v5 }
 0x1e4   :  { %v394_v46 = vpop.permute.xlu1 %393  ;;  %807 = vmatpush2.msra.mxu0 %v746_v1 }
 0x1e5   :  { %v442_v48 = vsel %vm163_vm1, %v438_v47, %v394_v46  ;;  %808 = vmatprep.subr.mxu0 %v1716_v5 }
 0x1e6   :  { %578 = vmatmul.mubr.f32.gmra.mxu1 %v442_v48  ;;  %809 = vmatpush2.msra.mxu0 %v745_v2 }
 0x1e7   :  { %810 = vmatprep.subr.mxu0 %v1716_v5 }
 0x1e8   :  { %811 = vmatpush2.msra.mxu0 %v744_v4 }
 0x1e9   :  { %812 = vmatprep.subr.mxu0 %v1716_v5 }
 0x1ea   :  { %813 = vmatpush2.msra.mxu0 %v743_v7 }
 0x1eb   :  { %814 = vmatprep.subr.mxu0 %v1716_v5 }
 0x1ec   :  { %815 = vmatpush2.msra.mxu0 %v742_v8 }
 0x1ed   :  { %816 = vmatprep.subr.mxu0 %v1716_v5 }
 0x1ee   :  { %817 = vmatpush2.msra.mxu0 %v741_v18 }
 0x1ef   :  { %818 = vmatprep.subr.mxu0 %v1716_v5 }
 0x1f0   :  { %819 = vmatpush2.msra.mxu0 %v740_v23 }
 0x1f1   :  { %820 = vmatprep.subr.mxu0 %v1716_v5 }
 0x1f2   :  { %821 = vmatpush2.msra.mxu0 %v739_v24 }
 0x1f3   :  { %822 = vmatprep.subr.mxu0 %v1716_v5 }
 0x1f4   :  { %823 = vmatpush2.msra.mxu0 %v738_v29 }
 0x1f5   :  { %824 = vmatprep.subr.mxu0 %v1716_v5 }
 0x1f6   :  { %825 = vmatpush2.msra.mxu0 %v737_v30 }
 0x1f7   :  { %826 = vmatprep.subr.mxu0 %v1716_v5 }
 0x1f8   :  { %827 = vmatpush2.msra.mxu0 %v736_v33 }
 0x1f9   :  { %828 = vmatprep.subr.mxu0 %v1716_v5 }
 0x1fa   :  { %829 = vmatpush2.msra.mxu0 %v735_v38 }
 0x1fb   :  { %1306 = vmatprep.subr.mxu0 %v1716_v5 }
 0x294   :  { %v564_v11 = vpop.f32.mrf.mxu1 }
 0x295   :  { %v565_v13 = vadd.f32 %v1525_v10, %v564_v11 }
 0x296   :  { %v566_v14 = vpop.f32.mrf.mxu1 }
 0x297   :  { %v583_v15 = vmax.f32 %v565_v13, 0.0 }
 0x298   :  { %v569_v17 = vpop.f32.mrf.mxu1 }
 0x299   :  { %587 = vst.msk [vmem:[#allocation2 + $0x3] sm:$0xff] %vm153_vm0, %v583_v15  ;;  %v570_v20 = vadd.f32 %v1525_v10, %v569_v17 }
 0x29a   :  { %v571_v21 = vpop.f32.mrf.mxu1 }
 0x29b   :  { %v584_v22 = vmax.f32 %v570_v20, 0.0 }
 0x29d   :  { %588 = vst.msk [vmem:[#allocation2 + $0xb] sm:$0xff] %vm153_vm0, %v584_v22 }
 0x29f   :  { %v574_v25 = vpop.f32.mrf.mxu1 }
 0x2a0   :  { %v575_v26 = vadd.f32 %v1525_v10, %v574_v25  ;;  %v595_v35 = vld [vmem:[#allocation2 + $0x1] sm:$0xff] }
 0x2a1   :  { %v576_v27 = vpop.f32.mrf.mxu1  ;;  %v599_v44 = vld [vmem:[#allocation2 + $0x2] sm:$0xff] }
 0x2a2   :  { %v585_v31 = vmax.f32 %v575_v26, 0.0  ;;  %v603_v49 = vld [vmem:[#allocation2 + $0x3] sm:$0xff] }
 0x2a3   :  { %v591_v15 = vld [vmem:[#allocation2] sm:$0xff] }
 0x2a4   :  { %589 = vst.msk [vmem:[#allocation2 + $0x1b] sm:$0xff] %vm153_vm0, %v585_v31  ;;  %v611_v34 = vld [vmem:[#allocation2 + $0x5] sm:$0xff]  ;;  %v612_v48 = vld [vmem:[#allocation2 + $0xd] sm:$0xff] }
 0x2a5   :  { %v596_v36 = vld [vmem:[#allocation2 + $0x9] sm:$0xff]  ;;  %671 = vrot.lane.b32.xlu1 %v611_v34, %s1717_s16 }
 0x2a6   :  { %v1619_v37 = vpack.i.bf16 %v596_v36, %v595_v35  ;;  %v579_v39 = vpop.f32.mrf.mxu1  ;;  %v600_v40 = vld [vmem:[#allocation2 + $0xa] sm:$0xff] }
 0x2a7   :  { %v580_v41 = vadd.f32 %v1525_v10, %v579_v39  ;;  %v615_v43 = vld [vmem:[#allocation2 + $0x6] sm:$0xff]  ;;  %v1624_v46 = vpack.i.bf16 %v600_v40, %v599_v44  ;;  %v616_v52 = vld [vmem:[#allocation2 + $0xe] sm:$0xff] }
 0x2a8   :  { %1620 = vrot.lane.b32.xlu0 %v1619_v37, %s1717_s16  ;;  %v581_v42 = vpop.f32.mrf.mxu1  ;;  %v604_v47 = vld [vmem:[#allocation2 + $0xb] sm:$0xff] }
 0x2a9   :  { %v586_v45 = vmax.f32 %v580_v41, 0.0  ;;  %687 = vrot.lane.b32.xlu1 %v615_v43, %s1718_s17  ;;  %v1629_v50 = vpack.i.bf16 %v604_v47, %v603_v49  ;;  %v607_v2 = vld [vmem:[#allocation2 + $0x4] sm:$0xff]  ;;  %v608_v25 = vld [vmem:[#allocation2 + $0xc] sm:$0xff] }
 0x2aa   :  { %v592_v31 = vld [vmem:[#allocation2 + $0x8] sm:$0xff] }
 0x2ab   :  { %590 = vst.msk [vmem:[#allocation2 + $0x23] sm:$0xff] %vm153_vm0, %v586_v45  ;;  %v605_v51 = vld [vmem:[#allocation2 + $0x1b] sm:$0xff] }
 0x2ac   :  { %1625 = vrot.lane.b32.xlu0 %v1624_v46, %s1718_s17  ;;  %v597_v53 = vld [vmem:[#allocation2 + $0x19] sm:$0xff] }
 0x2ad   :  { %673 = vrot.lane.b32.xlu1 %v612_v48, %s1717_s16  ;;  %v601_v58 = vld [vmem:[#allocation2 + $0x1a] sm:$0xff] }
 0x2ae   :  { %v593_v43 = vld [vmem:[#allocation2 + $0x18] sm:$0xff] }
 0x2b0   :  { %1630 = vrot.lane.b32.xlu0 %v1629_v50, %s1719_s25 }
 0x2b1   :  { %659 = vrot.lane.b32.xlu1 %v605_v51, %s1719_s25 }
 0x2b2   :  { %v598_v54 = vld [vmem:[#allocation2 + $0x21] sm:$0xff] }
 0x2b3   :  { %v1634_v55 = vpack.i.bf16 %v598_v54, %v597_v53  ;;  %v602_v56 = vld [vmem:[#allocation2 + $0x22] sm:$0xff] }
 0x2b4   :  { %689 = vrot.lane.b32.xlu0 %v616_v52, %s1718_s17  ;;  %v613_v57 = vld [vmem:[#allocation2 + $0x1d] sm:$0xff]  ;;  %v1639_v59 = vpack.i.bf16 %v602_v56, %v601_v58  ;;  %v618_v61 = vld [vmem:[#allocation2 + $0x26] sm:$0xff] }
 0x2b5   :  { %1635 = vrot.lane.b32.xlu1 %v1634_v55, %s1717_s16  ;;  %v617_v60 = vld [vmem:[#allocation2 + $0x1e] sm:$0xff] }
 0x2b6   :  { %v614_v62 = vld [vmem:[#allocation2 + $0x25] sm:$0xff]  ;;  %v609_v41 = vld [vmem:[#allocation2 + $0x1c] sm:$0xff] }
 0x2b7   :  { %v606_v63 = vld [vmem:[#allocation2 + $0x23] sm:$0xff] }
 0x2b8   :  { %675 = vrot.lane.b32.xlu0 %v613_v57, %s1717_s16  ;;  %v610_v52 = vld [vmem:[#allocation2 + $0x24] sm:$0xff] }
 0x2b9   :  { %1640 = vrot.lane.b32.xlu1 %v1639_v59, %s1718_s17  ;;  %v594_v57 = vld [vmem:[#allocation2 + $0x20] sm:$0xff] }
 0x2bc   :  { %691 = vrot.lane.b32.xlu0 %v617_v60, %s1718_s17 }
 0x2bd   :  { %693 = vrot.lane.b32.xlu1 %v618_v61, %s1718_s17 }
 0x2c0   :  { %677 = vrot.lane.b32.xlu0 %v614_v62, %s1717_s16  ;;  %v1006_v62 = vld [vmem:[%s2763_s7 + $0x78] sm:$0xff] }
 0x2c1   :  { %1039 = vmatpush1.msra.mxu1 %v1006_v62 }
 0x2c2   :  { %1040 = vmatprep.subr.mxu1 %v1716_v5 }
 0x2c4   :  { %661 = vrot.lane.b32.xlu0 %v606_v63, %s1719_s25  ;;  %v1005_v63 = vld [vmem:[%s2763_s7 + $0x70] sm:$0xff] }
 0x2c5   :  { %1041 = vmatpush1.msra.mxu1 %v1005_v63 }
 0x2c6   :  { %1042 = vmatprep.subr.mxu1 %v1716_v5 }
 0x317   :  { %v672_v0 = vpop.permute.xlu1 %671 }
 0x318   :  { %v711_v4 = vsel %vm153_vm0, %v607_v2, %v672_v0  ;;  %v1004_v0 = vld [vmem:[%s2763_s7 + $0x68] sm:$0xff]  ;;  %v1002_v2 = vld [vmem:[%s2763_s7 + $0x58] sm:$0xff] }
 0x319   :  { %1043 = vmatpush1.msra.mxu1 %v1004_v0 }
 0x31a   :  { %v1621_v1 = vpop.permute.xlu0 %1620  ;;  %1044 = vmatprep.subr.mxu1 %v1716_v5 }
 0x31b   :  { %v688_v7 = vpop.permute.xlu1 %687  ;;  %v1622_v11 = vunpack.i.l.bf16 %v1621_v1  ;;  %v1623_v18 = vunpack.i.h.bf16 %v1621_v1  ;;  %v1003_v1 = vld [vmem:[%s2763_s7 + $0x60] sm:$0xff] }
 0x31c   :  { %v715_v8 = vsel %vm158_vm2, %v711_v4, %v688_v7  ;;  %1045 = vmatpush1.msra.mxu1 %v1003_v1  ;;  %v1001_v4 = vld [vmem:[%s2763_s7 + $0x50] sm:$0xff]  ;;  %v1000_v7 = vld [vmem:[%s2763_s7 + $0x48] sm:$0xff] }
 0x31d   :  { %1531 = vmatprep.mubr.msk.f32.mxu0 %vm163_vm1, %v715_v8  ;;  %v699_v20 = vsel %vm153_vm0, %v591_v15, %v1622_v11  ;;  %v700_v34 = vsel %vm153_vm0, %v592_v31, %v1623_v18  ;;  %1046 = vmatprep.subr.mxu1 %v1716_v5  ;;  %v999_v8 = vld [vmem:[%s2763_s7 + $0x40] sm:$0xff]  ;;  %v997_v11 = vld [vmem:[%s2763_s7 + $0x30] sm:$0xff]  ;;  %v994_v15 = vld [vmem:[%s2763_s7 + $0x18] sm:$0xff] }
 0x31e   :  { %v1626_v10 = vpop.permute.xlu0 %1625  ;;  %1047 = vmatpush1.msra.mxu1 %v1002_v2  ;;  %v992_v18 = vld [vmem:[%s2763_s7 + $0x8] sm:$0xff] }
 0x31f   :  { %v1627_v13 = vunpack.i.l.bf16 %v1626_v10  ;;  %v674_v14 = vpop.permute.xlu1 %673  ;;  %v1628_v22 = vunpack.i.h.bf16 %v1626_v10  ;;  %1048 = vmatprep.subr.mxu1 %v1716_v5  ;;  %v998_v10 = vld [vmem:[%s2763_s7 + $0x38] sm:$0xff] }
 0x320   :  { %v712_v29 = vsel %vm153_vm0, %v608_v25, %v674_v14  ;;  %1049 = vmatpush1.msra.mxu1 %v1001_v4  ;;  %v995_v14 = vld [vmem:[%s2763_s7 + $0x20] sm:$0xff]  ;;  %v1014_v25 = vld [vmem:[%s2763_s7 + $0xb8] sm:$0xff] }
 0x321   :  { %v703_v23 = vsel %vm158_vm2, %v699_v20, %v1627_v13  ;;  %v704_v36 = vsel %vm158_vm2, %v700_v34, %v1628_v22  ;;  %1050 = vmatprep.subr.mxu1 %v1716_v5  ;;  %v996_v13 = vld [vmem:[%s2763_s7 + $0x28] sm:$0xff]  ;;  %v991_v20 = vld [vmem:[%s2763_s7] sm:$0xff]  ;;  %v1017_v22 = vld [vmem:[%s2763_s7 + $0xd0] sm:$0xff] }
 0x322   :  { %v1631_v17 = vpop.permute.xlu0 %1630  ;;  %1051 = vmatpush1.msra.mxu1 %v1000_v7 }
 0x323   :  { %v1632_v21 = vunpack.i.l.bf16 %v1631_v17  ;;  %v660_v24 = vpop.permute.xlu1 %659  ;;  %v1633_v26 = vunpack.i.h.bf16 %v1631_v17  ;;  %1052 = vmatprep.subr.mxu1 %v1716_v5  ;;  %v993_v17 = vld [vmem:[%s2763_s7 + $0x10] sm:$0xff] }
 0x324   :  { %1053 = vmatpush1.msra.mxu1 %v999_v8 }
 0x325   :  { %v707_v27 = vsel %vm163_vm1, %v703_v23, %v1632_v21  ;;  %v708_v37 = vsel %vm163_vm1, %v704_v36, %v1633_v26  ;;  %1054 = vmatprep.subr.mxu1 %v1716_v5  ;;  %v1018_v21 = vld [vmem:[%s2763_s7 + $0xd8] sm:$0xff]  ;;  %v1016_v23 = vld [vmem:[%s2763_s7 + $0xc8] sm:$0xff]  ;;  %v1530_v26 = vld [vmem:[%s2762_s6] ss:$0 sm:$0xff] }
 0x326   :  { %v690_v30 = vpop.permute.xlu0 %689  ;;  %831 = vmatmul.mubr.f32.vlgmr.msra.gmra.mxu0 %v707_v27  ;;  %1055 = vmatpush1.msra.mxu1 %v998_v10 }
 0x327   :  { %v716_v33 = vsel %vm158_vm2, %v712_v29, %v690_v30  ;;  %v1636_v35 = vpop.permute.xlu1 %1635  ;;  %1056 = vmatprep.subr.mxu1 %v1716_v5 }
 0x328   :  { %1532 = vmatprep.mubr.msk.f32.mxu0 %vm163_vm1, %v716_v33  ;;  %v1637_v38 = vunpack.i.l.bf16 %v1636_v35  ;;  %v1638_v50 = vunpack.i.h.bf16 %v1636_v35  ;;  %1057 = vmatpush1.msra.mxu1 %v997_v11 }
 0x329   :  { %1058 = vmatprep.subr.mxu1 %v1716_v5 }
 0x32a   :  { %v676_v39 = vpop.permute.xlu0 %675  ;;  %836 = vmatmul.mubr.f32.gmra.mxu0 %v708_v37  ;;  %v701_v46 = vsel %vm153_vm0, %v593_v43, %v1637_v38  ;;  %v702_v58 = vsel %vm153_vm0, %v594_v57, %v1638_v50  ;;  %1059 = vmatpush1.msra.mxu1 %v996_v13  ;;  %v1013_v37 = vld [vmem:[%s2763_s7 + $0xb0] sm:$0xff]  ;;  %v1007_v50 = vld [vmem:[%s2763_s7 + $0x80] sm:$0xff] }
 0x32b   :  { %v1641_v40 = vpop.permute.xlu1 %1640  ;;  %v713_v44 = vsel %vm153_vm0, %v609_v41, %v676_v39  ;;  %1060 = vmatprep.subr.mxu1 %v1716_v5  ;;  %v1011_v39 = vld [vmem:[%s2763_s7 + $0xa0] sm:$0xff]  ;;  %v1009_v43 = vld [vmem:[%s2763_s7 + $0x90] sm:$0xff] }
 0x32c   :  { %v1642_v42 = vunpack.i.l.bf16 %v1641_v40  ;;  %v1643_v51 = vunpack.i.h.bf16 %v1641_v40  ;;  %1061 = vmatpush1.msra.mxu1 %v995_v14 }
 0x32d   :  { %1062 = vmatprep.subr.mxu1 %v1716_v5 }
 0x32e   :  { %v692_v45 = vpop.permute.xlu0 %691  ;;  %v705_v48 = vsel %vm158_vm2, %v701_v46, %v1642_v42  ;;  %v706_v60 = vsel %vm158_vm2, %v702_v58, %v1643_v51  ;;  %1063 = vmatpush1.msra.mxu1 %v994_v15  ;;  %v1010_v42 = vld [vmem:[%s2763_s7 + $0x98] sm:$0xff] }
 0x32f   :  { %v717_v47 = vsel %vm158_vm2, %v713_v44, %v692_v45  ;;  %v709_v49 = vsel %vm163_vm1, %v705_v48, %v660_v24  ;;  %v694_v54 = vpop.permute.xlu1 %693  ;;  %1064 = vmatprep.subr.mxu1 %v1716_v5  ;;  %v1015_v24 = vld [vmem:[%s2763_s7 + $0xc0] sm:$0xff] }
 0x330   :  { %1533 = vmatprep.mubr.msk.f32.mxu0 %vm163_vm1, %v717_v47  ;;  %1065 = vmatpush1.msra.mxu1 %v993_v17 }
 0x331   :  { %841 = vmatmul.mubr.f32.gmra.mxu0 %v709_v49  ;;  %1066 = vmatprep.subr.mxu1 %v1716_v5 }
 0x332   :  { %v678_v53 = vpop.permute.xlu0 %677  ;;  %1067 = vmatpush1.msra.mxu1 %v992_v18 }
 0x333   :  { %v714_v55 = vsel %vm153_vm0, %v610_v52, %v678_v53  ;;  %1068 = vmatprep.subr.mxu1 %v1716_v5 }
 0x334   :  { %v718_v56 = vsel %vm158_vm2, %v714_v55, %v694_v54  ;;  %1069 = vmatpush1.msra.mxu1 %v991_v20 }
 0x335   :  { %1534 = vmatprep.mubr.msk.f32.mxu0 %vm163_vm1, %v718_v56  ;;  %1078 = vmatprep.subr.mxu1 %v1716_v5 }
 0x336   :  { %v662_v59 = vpop.permute.xlu0 %661  ;;  %1079 = vmatpush2.msra.mxu1 %v1018_v21 }
 0x337   :  { %v710_v61 = vsel %vm163_vm1, %v706_v60, %v662_v59  ;;  %1080 = vmatprep.subr.mxu1 %v1716_v5 }
 0x338   :  { %846 = vmatmul.mubr.f32.gmra.mxu0 %v710_v61  ;;  %1081 = vmatpush2.msra.mxu1 %v1017_v22 }
 0x339   :  { %1082 = vmatprep.subr.mxu1 %v1716_v5 }
 0x33a   :  { %1083 = vmatpush2.msra.mxu1 %v1016_v23 }
 0x33b   :  { %1084 = vmatprep.subr.mxu1 %v1716_v5 }
 0x33c   :  { %1085 = vmatpush2.msra.mxu1 %v1015_v24 }
 0x33d   :  { %1086 = vmatprep.subr.mxu1 %v1716_v5 }
 0x33e   :  { %1087 = vmatpush2.msra.mxu1 %v1014_v25 }
 0x33f   :  { %1088 = vmatprep.subr.mxu1 %v1716_v5 }
 0x340   :  { %1089 = vmatpush2.msra.mxu1 %v1013_v37 }
 0x341   :  { %1090 = vmatprep.subr.mxu1 %v1716_v5 }
 0x3e6   :  { %v832_v27 = vpop.f32.mrf.mxu0 }
 0x3e7   :  { %v833_v29 = vadd.f32 %v1530_v26, %v832_v27 }
 0x3e8   :  { %v834_v30 = vpop.f32.mrf.mxu0 }
 0x3e9   :  { %v2464_v31 = vadd.f32 %v833_v29, %v308_v6  ;;  %v1012_v6 = vld [vmem:[%s2763_s7 + $0xa8] sm:$0xff] }
 0x3ea   :  { %v837_v33 = vpop.f32.mrf.mxu0  ;;  %1091 = vmatpush2.msra.mxu1 %v1012_v6 }
 0x3eb   :  { %v855_v34 = vmax.f32 %v2464_v31, 0.0  ;;  %v838_v35 = vadd.f32 %v1530_v26, %v837_v33  ;;  %1092 = vmatprep.subr.mxu1 %v1716_v5 }
 0x3ec   :  { %v839_v36 = vpop.f32.mrf.mxu0  ;;  %1093 = vmatpush2.msra.mxu1 %v1011_v39 }
 0x3ed   :  { %859 = vst.msk [vmem:[#allocation2 + $0x3] sm:$0xff] %vm153_vm0, %v855_v34  ;;  %v2475_v38 = vadd.f32 %v838_v35, %v309_v12  ;;  %1094 = vmatprep.subr.mxu1 %v1716_v5 }
 0x3ee   :  { %1095 = vmatpush2.msra.mxu1 %v1010_v42 }
 0x3ef   :  { %v856_v3 = vmax.f32 %v2475_v38, 0.0  ;;  %1096 = vmatprep.subr.mxu1 %v1716_v5 }
 0x3f0   :  { %1097 = vmatpush2.msra.mxu1 %v1009_v43 }
 0x3f1   :  { %860 = vst.msk [vmem:[#allocation2 + $0xb] sm:$0xff] %vm153_vm0, %v856_v3  ;;  %v842_v9 = vpop.f32.mrf.mxu0  ;;  %1098 = vmatprep.subr.mxu1 %v1716_v5 }
 0x3f2   :  { %v843_v12 = vadd.f32 %v1530_v26, %v842_v9  ;;  %1099 = vmatpush2.msra.mxu1 %v1008_v16 }
 0x3f3   :  { %v844_v40 = vpop.f32.mrf.mxu0  ;;  %1100 = vmatprep.subr.mxu1 %v1716_v5 }
 0x3f4   :  { %v2491_v41 = vadd.f32 %v843_v12, %v310_v19  ;;  %v867_v46 = vld [vmem:[#allocation2 + $0x1] sm:$0xff]  ;;  %1101 = vmatpush2.msra.mxu1 %v1007_v50 }
 0x3f5   :  { %v871_v55 = vld [vmem:[#allocation2 + $0x2] sm:$0xff]  ;;  %1552 = vmatprep.subr.mxu1 %v1716_v5 }
 0x3f6   :  { %v857_v44 = vmax.f32 %v2491_v41, 0.0 }
 0x3f8   :  { %861 = vst.msk [vmem:[#allocation2 + $0x1b] sm:$0xff] %vm153_vm0, %v857_v44  ;;  %v847_v19 = vpop.f32.mrf.mxu0  ;;  %v883_v45 = vld [vmem:[#allocation2 + $0x5] sm:$0xff]  ;;  %v884_v28 = vld [vmem:[#allocation2 + $0xd] sm:$0xff] }
 0x3f9   :  { %v868_v47 = vld [vmem:[#allocation2 + $0x9] sm:$0xff]  ;;  %v848_v48 = vadd.f32 %v1530_v26, %v847_v19  ;;  %943 = vrot.lane.b32.xlu0 %v883_v45, %s1717_s16  ;;  %v863_v26 = vld [vmem:[#allocation2] sm:$0xff] }
 0x3fa   :  { %v1644_v49 = vpack.i.bf16 %v868_v47, %v867_v46  ;;  %v849_v51 = vpop.f32.mrf.mxu0  ;;  %v872_v52 = vld [vmem:[#allocation2 + $0xa] sm:$0xff] }
 0x3fb   :  { %v2515_v53 = vadd.f32 %v848_v48, %v311_v32  ;;  %v887_v54 = vld [vmem:[#allocation2 + $0x6] sm:$0xff]  ;;  %v1649_v57 = vpack.i.bf16 %v872_v52, %v871_v55  ;;  %v888_v61 = vld [vmem:[#allocation2 + $0xe] sm:$0xff] }
 0x3fc   :  { %1645 = vrot.lane.b32.xlu1 %v1644_v49, %s1717_s16  ;;  %v876_v58 = vld [vmem:[#allocation2 + $0xb] sm:$0xff]  ;;  %v875_v32 = vld [vmem:[#allocation2 + $0x3] sm:$0xff] }
 0x3fd   :  { %v858_v56 = vmax.f32 %v2515_v53, 0.0  ;;  %959 = vrot.lane.b32.xlu0 %v887_v54, %s1718_s17  ;;  %v1654_v59 = vpack.i.bf16 %v876_v58, %v875_v32  ;;  %v879_v17 = vld [vmem:[#allocation2 + $0x4] sm:$0xff]  ;;  %v880_v6 = vld [vmem:[#allocation2 + $0xc] sm:$0xff] }
 0x3fe   :  { %v864_v42 = vld [vmem:[#allocation2 + $0x8] sm:$0xff] }
 0x3ff   :  { %862 = vst.msk [vmem:[#allocation2 + $0x23] sm:$0xff] %vm153_vm0, %v858_v56  ;;  %v877_v60 = vld [vmem:[#allocation2 + $0x1b] sm:$0xff] }
 0x400   :  { %1650 = vrot.lane.b32.xlu1 %v1649_v57, %s1718_s17  ;;  %v869_v62 = vld [vmem:[#allocation2 + $0x19] sm:$0xff] }
 0x401   :  { %945 = vrot.lane.b32.xlu0 %v884_v28, %s1717_s16  ;;  %v873_v4 = vld [vmem:[#allocation2 + $0x1a] sm:$0xff] }
 0x402   :  { %v865_v52 = vld [vmem:[#allocation2 + $0x18] sm:$0xff] }
 0x404   :  { %1655 = vrot.lane.b32.xlu1 %v1654_v59, %s1719_s25 }
 0x405   :  { %931 = vrot.lane.b32.xlu0 %v877_v60, %s1719_s25 }
 0x406   :  { %v870_v63 = vld [vmem:[#allocation2 + $0x21] sm:$0xff] }
 0x407   :  { %v1659_v0 = vpack.i.bf16 %v870_v63, %v869_v62  ;;  %v874_v1 = vld [vmem:[#allocation2 + $0x22] sm:$0xff] }
 0x408   :  { %961 = vrot.lane.b32.xlu1 %v888_v61, %s1718_s17  ;;  %v885_v2 = vld [vmem:[#allocation2 + $0x1d] sm:$0xff]  ;;  %v1664_v7 = vpack.i.bf16 %v874_v1, %v873_v4  ;;  %v890_v10 = vld [vmem:[#allocation2 + $0x26] sm:$0xff] }
 0x409   :  { %1660 = vrot.lane.b32.xlu0 %v1659_v0, %s1717_s16  ;;  %v889_v8 = vld [vmem:[#allocation2 + $0x1e] sm:$0xff] }
 0x40a   :  { %v886_v11 = vld [vmem:[#allocation2 + $0x25] sm:$0xff]  ;;  %v881_v50 = vld [vmem:[#allocation2 + $0x1c] sm:$0xff] }
 0x40b   :  { %v878_v13 = vld [vmem:[#allocation2 + $0x23] sm:$0xff] }
 0x40c   :  { %947 = vrot.lane.b32.xlu1 %v885_v2, %s1717_s16  ;;  %v882_v61 = vld [vmem:[#allocation2 + $0x24] sm:$0xff] }
 0x40d   :  { %1665 = vrot.lane.b32.xlu0 %v1664_v7, %s1718_s17  ;;  %v866_v2 = vld [vmem:[#allocation2 + $0x20] sm:$0xff] }
 0x410   :  { %963 = vrot.lane.b32.xlu1 %v889_v8, %s1718_s17 }
 0x411   :  { %965 = vrot.lane.b32.xlu0 %v890_v10, %s1718_s17 }
 0x414   :  { %949 = vrot.lane.b32.xlu1 %v886_v11, %s1717_s16  ;;  %v1274_v11 = vld [vmem:[%s2765_s9 + $0x78] sm:$0xff] }
 0x415   :  { %1307 = vmatpush1.msra.mxu0 %v1274_v11 }
 0x416   :  { %1308 = vmatprep.subr.mxu0 %v1716_v5 }
 0x418   :  { %933 = vrot.lane.b32.xlu1 %v878_v13, %s1719_s25  ;;  %v1273_v13 = vld [vmem:[%s2765_s9 + $0x70] sm:$0xff] }
 0x419   :  { %1309 = vmatpush1.msra.mxu0 %v1273_v13 }
 0x41a   :  { %1310 = vmatprep.subr.mxu0 %v1716_v5 }
 0x46b   :  { %v944_v14 = vpop.permute.xlu0 %943 }
 0x46c   :  { %v983_v18 = vsel %vm153_vm0, %v879_v17, %v944_v14  ;;  %v1272_v14 = vld [vmem:[%s2765_s9 + $0x68] sm:$0xff]  ;;  %v1270_v17 = vld [vmem:[%s2765_s9 + $0x58] sm:$0xff] }
 0x46d   :  { %1311 = vmatpush1.msra.mxu0 %v1272_v14 }
 0x46e   :  { %v1646_v15 = vpop.permute.xlu1 %1645  ;;  %1312 = vmatprep.subr.mxu0 %v1716_v5 }
 0x46f   :  { %v960_v20 = vpop.permute.xlu0 %959  ;;  %v1647_v23 = vunpack.i.l.bf16 %v1646_v15  ;;  %v1648_v29 = vunpack.i.h.bf16 %v1646_v15  ;;  %v1271_v15 = vld [vmem:[%s2765_s9 + $0x60] sm:$0xff] }
 0x470   :  { %v987_v21 = vsel %vm158_vm2, %v983_v18, %v960_v20  ;;  %1313 = vmatpush1.msra.mxu0 %v1271_v15  ;;  %v1269_v18 = vld [vmem:[%s2765_s9 + $0x50] sm:$0xff]  ;;  %v1268_v20 = vld [vmem:[%s2765_s9 + $0x48] sm:$0xff] }
 0x471   :  { %1536 = vmatprep.mubr.msk.f32.mxu1 %vm163_vm1, %v987_v21  ;;  %v971_v30 = vsel %vm153_vm0, %v863_v26, %v1647_v23  ;;  %v972_v16 = vsel %vm153_vm0, %v864_v42, %v1648_v29  ;;  %1314 = vmatprep.subr.mxu0 %v1716_v5  ;;  %v1267_v21 = vld [vmem:[%s2765_s9 + $0x40] sm:$0xff]  ;;  %v1265_v23 = vld [vmem:[%s2765_s9 + $0x30] sm:$0xff]  ;;  %v1262_v26 = vld [vmem:[%s2765_s9 + $0x18] sm:$0xff] }
 0x472   :  { %v1651_v22 = vpop.permute.xlu1 %1650  ;;  %1315 = vmatpush1.msra.mxu0 %v1270_v17  ;;  %v1260_v29 = vld [vmem:[%s2765_s9 + $0x8] sm:$0xff] }
 0x473   :  { %v1652_v24 = vunpack.i.l.bf16 %v1651_v22  ;;  %v946_v25 = vpop.permute.xlu0 %945  ;;  %v1653_v35 = vunpack.i.h.bf16 %v1651_v22  ;;  %1316 = vmatprep.subr.mxu0 %v1716_v5  ;;  %v1266_v22 = vld [vmem:[%s2765_s9 + $0x38] sm:$0xff] }
 0x474   :  { %v984_v12 = vsel %vm153_vm0, %v880_v6, %v946_v25  ;;  %1317 = vmatpush1.msra.mxu0 %v1269_v18  ;;  %v1263_v25 = vld [vmem:[%s2765_s9 + $0x20] sm:$0xff]  ;;  %v1282_v6 = vld [vmem:[%s2765_s9 + $0xb8] sm:$0xff] }
 0x475   :  { %v975_v36 = vsel %vm158_vm2, %v971_v30, %v1652_v24  ;;  %v976_v45 = vsel %vm158_vm2, %v972_v16, %v1653_v35  ;;  %1318 = vmatprep.subr.mxu0 %v1716_v5  ;;  %v1264_v24 = vld [vmem:[%s2765_s9 + $0x28] sm:$0xff]  ;;  %v1259_v30 = vld [vmem:[%s2765_s9] sm:$0xff]  ;;  %v1285_v35 = vld [vmem:[%s2765_s9 + $0xd0] sm:$0xff] }
 0x476   :  { %v1656_v27 = vpop.permute.xlu1 %1655  ;;  %1319 = vmatpush1.msra.mxu0 %v1268_v20  ;;  %v1281_v16 = vld [vmem:[%s2765_s9 + $0xb0] sm:$0xff] }
 0x477   :  { %v1657_v33 = vunpack.i.l.bf16 %v1656_v27  ;;  %v932_v37 = vpop.permute.xlu0 %931  ;;  %v1658_v39 = vunpack.i.h.bf16 %v1656_v27  ;;  %1320 = vmatprep.subr.mxu0 %v1716_v5  ;;  %v1261_v27 = vld [vmem:[%s2765_s9 + $0x10] sm:$0xff] }
 0x478   :  { %1321 = vmatpush1.msra.mxu0 %v1267_v21 }
 0x479   :  { %v979_v9 = vsel %vm163_vm1, %v975_v36, %v1657_v33  ;;  %v980_v46 = vsel %vm163_vm1, %v976_v45, %v1658_v39  ;;  %1322 = vmatprep.subr.mxu0 %v1716_v5  ;;  %v1286_v33 = vld [vmem:[%s2765_s9 + $0xd8] sm:$0xff]  ;;  %v1284_v36 = vld [vmem:[%s2765_s9 + $0xc8] sm:$0xff]  ;;  %v1535_v39 = vld [vmem:[%s2764_s8] ss:$0 sm:$0xff] }
 0x47a   :  { %v962_v40 = vpop.permute.xlu1 %961  ;;  %1103 = vmatmul.mubr.f32.vlgmr.msra.gmra.mxu1 %v979_v9  ;;  %1323 = vmatpush1.msra.mxu0 %v1266_v22 }
 0x47b   :  { %v988_v43 = vsel %vm158_vm2, %v984_v12, %v962_v40  ;;  %v1661_v19 = vpop.permute.xlu0 %1660  ;;  %1324 = vmatprep.subr.mxu0 %v1716_v5 }
 0x47c   :  { %1537 = vmatprep.mubr.msk.f32.mxu1 %vm163_vm1, %v988_v43  ;;  %v1662_v47 = vunpack.i.l.bf16 %v1661_v19  ;;  %v1663_v59 = vunpack.i.h.bf16 %v1661_v19  ;;  %1325 = vmatpush1.msra.mxu0 %v1265_v23 }
 0x47d   :  { %1326 = vmatprep.subr.mxu0 %v1716_v5 }
 0x47e   :  { %v948_v48 = vpop.permute.xlu1 %947  ;;  %1108 = vmatmul.mubr.f32.gmra.mxu1 %v980_v46  ;;  %v973_v57 = vsel %vm153_vm0, %v865_v52, %v1662_v47  ;;  %v974_v4 = vsel %vm153_vm0, %v866_v2, %v1663_v59  ;;  %1327 = vmatpush1.msra.mxu0 %v1264_v24  ;;  %v1280_v47 = vld [vmem:[%s2765_s9 + $0xa8] sm:$0xff]  ;;  %v1278_v52 = vld [vmem:[%s2765_s9 + $0x98] sm:$0xff] }
 0x47f   :  { %v1666_v49 = vpop.permute.xlu0 %1665  ;;  %v985_v54 = vsel %vm153_vm0, %v881_v50, %v948_v48  ;;  %1328 = vmatprep.subr.mxu0 %v1716_v5  ;;  %v1279_v48 = vld [vmem:[%s2765_s9 + $0xa0] sm:$0xff] }
 0x480   :  { %v1667_v51 = vunpack.i.l.bf16 %v1666_v49  ;;  %v1668_v60 = vunpack.i.h.bf16 %v1666_v49  ;;  %1329 = vmatpush1.msra.mxu0 %v1263_v25 }
 0x481   :  { %1330 = vmatprep.subr.mxu0 %v1716_v5 }
 0x482   :  { %v964_v55 = vpop.permute.xlu1 %963  ;;  %v977_v28 = vsel %vm158_vm2, %v973_v57, %v1667_v51  ;;  %v978_v8 = vsel %vm158_vm2, %v974_v4, %v1668_v60  ;;  %1331 = vmatpush1.msra.mxu0 %v1262_v26  ;;  %v1276_v57 = vld [vmem:[%s2765_s9 + $0x88] sm:$0xff]  ;;  %v1275_v60 = vld [vmem:[%s2765_s9 + $0x80] sm:$0xff] }
 0x483   :  { %v989_v58 = vsel %vm158_vm2, %v985_v54, %v964_v55  ;;  %v981_v32 = vsel %vm163_vm1, %v977_v28, %v932_v37  ;;  %v966_v63 = vpop.permute.xlu0 %965  ;;  %1332 = vmatprep.subr.mxu0 %v1716_v5  ;;  %v1283_v37 = vld [vmem:[%s2765_s9 + $0xc0] sm:$0xff]  ;;  %v1277_v54 = vld [vmem:[%s2765_s9 + $0x90] sm:$0xff] }
 0x484   :  { %1538 = vmatprep.mubr.msk.f32.mxu1 %vm163_vm1, %v989_v58  ;;  %1333 = vmatpush1.msra.mxu0 %v1261_v27 }
 0x485   :  { %1113 = vmatmul.mubr.f32.gmra.mxu1 %v981_v32  ;;  %1334 = vmatprep.subr.mxu0 %v1716_v5 }
 0x486   :  { %v950_v62 = vpop.permute.xlu1 %949  ;;  %1335 = vmatpush1.msra.mxu0 %v1260_v29 }
 0x487   :  { %v986_v0 = vsel %vm153_vm0, %v882_v61, %v950_v62  ;;  %1336 = vmatprep.subr.mxu0 %v1716_v5 }
 0x488   :  { %v990_v1 = vsel %vm158_vm2, %v986_v0, %v966_v63  ;;  %1337 = vmatpush1.msra.mxu0 %v1259_v30 }
 0x489   :  { %1539 = vmatprep.mubr.msk.f32.mxu1 %vm163_vm1, %v990_v1  ;;  %1346 = vmatprep.subr.mxu0 %v1716_v5 }
 0x48a   :  { %v934_v7 = vpop.permute.xlu1 %933  ;;  %1347 = vmatpush2.msra.mxu0 %v1286_v33 }
 0x48b   :  { %v982_v10 = vsel %vm163_vm1, %v978_v8, %v934_v7  ;;  %1348 = vmatprep.subr.mxu0 %v1716_v5 }
 0x48c   :  { %1118 = vmatmul.mubr.f32.gmra.mxu1 %v982_v10  ;;  %1349 = vmatpush2.msra.mxu0 %v1285_v35 }
 0x48d   :  { %1350 = vmatprep.subr.mxu0 %v1716_v5  ;;  %1560 = vmatprep.mubr.msk.f32.mxu1 %vm1720_vm4, %v1716_v5 }
 0x48e   :  { %1351 = vmatpush2.msra.mxu0 %v1284_v36 }
 0x48f   :  { %1352 = vmatprep.subr.mxu0 %v1716_v5 }
 0x490   :  { %1353 = vmatpush2.msra.mxu0 %v1283_v37 }
 0x491   :  { %1354 = vmatprep.subr.mxu0 %v1716_v5 }
 0x492   :  { %1355 = vmatpush2.msra.mxu0 %v1282_v6 }
 0x493   :  { %1356 = vmatprep.subr.mxu0 %v1716_v5 }
 0x494   :  { %1357 = vmatpush2.msra.mxu0 %v1281_v16 }
 0x495   :  { %1358 = vmatprep.subr.mxu0 %v1716_v5 }
 0x496   :  { %1359 = vmatpush2.msra.mxu0 %v1280_v47 }
 0x497   :  { %1360 = vmatprep.subr.mxu0 %v1716_v5 }
 0x498   :  { %1361 = vmatpush2.msra.mxu0 %v1279_v48 }
 0x499   :  { %1362 = vmatprep.subr.mxu0 %v1716_v5 }
 0x49a   :  { %1363 = vmatpush2.msra.mxu0 %v1278_v52 }
 0x49b   :  { %1364 = vmatprep.subr.mxu0 %v1716_v5 }
 0x49c   :  { %1365 = vmatpush2.msra.mxu0 %v1277_v54 }
 0x49d   :  { %1366 = vmatprep.subr.mxu0 %v1716_v5 }
 0x49e   :  { %1367 = vmatpush2.msra.mxu0 %v1276_v57 }
 0x49f   :  { %1368 = vmatprep.subr.mxu0 %v1716_v5 }
 0x4a0   :  { %1369 = vmatpush2.msra.mxu0 %v1275_v60 }
 0x53a   :  { %v1104_v9 = vpop.f32.mrf.mxu1 }
 0x53b   :  { %v1105_v12 = vadd.f32 %v1535_v39, %v1104_v9 }
 0x53c   :  { %v1106_v40 = vpop.f32.mrf.mxu1 }
 0x53d   :  { %v1123_v42 = vmax.f32 %v1105_v12, 0.0 }
 0x53e   :  { %v1109_v43 = vpop.f32.mrf.mxu1 }
 0x53f   :  { %1127 = vst.msk [vmem:[#allocation2 + $0x3] sm:$0xff] %vm153_vm0, %v1123_v42  ;;  %v1110_v19 = vadd.f32 %v1535_v39, %v1109_v43 }
 0x540   :  { %v1111_v45 = vpop.f32.mrf.mxu1 }
 0x541   :  { %v1124_v46 = vmax.f32 %v1110_v19, 0.0 }
 0x543   :  { %1128 = vst.msk [vmem:[#allocation2 + $0xb] sm:$0xff] %vm153_vm0, %v1124_v46 }
 0x545   :  { %v1114_v49 = vpop.f32.mrf.mxu1 }
 0x546   :  { %v1115_v50 = vadd.f32 %v1535_v39, %v1114_v49  ;;  %v1135_v28 = vld [vmem:[#allocation2 + $0x1] sm:$0xff] }
 0x547   :  { %v1116_v51 = vpop.f32.mrf.mxu1  ;;  %v1139_v2 = vld [vmem:[#allocation2 + $0x2] sm:$0xff] }
 0x548   :  { %v1125_v55 = vmax.f32 %v1115_v50, 0.0  ;;  %v1143_v11 = vld [vmem:[#allocation2 + $0x3] sm:$0xff] }
 0x549   :  { %v1131_v42 = vld [vmem:[#allocation2] sm:$0xff] }
 0x54a   :  { %1129 = vst.msk [vmem:[#allocation2 + $0x1b] sm:$0xff] %vm153_vm0, %v1125_v55  ;;  %v1151_v58 = vld [vmem:[#allocation2 + $0x5] sm:$0xff]  ;;  %v1152_v10 = vld [vmem:[#allocation2 + $0xd] sm:$0xff] }
 0x54b   :  { %v1136_v32 = vld [vmem:[#allocation2 + $0x9] sm:$0xff]  ;;  %1211 = vrot.lane.b32.xlu1 %v1151_v58, %s1717_s16 }
 0x54c   :  { %v1669_v59 = vpack.i.bf16 %v1136_v32, %v1135_v28  ;;  %v1119_v61 = vpop.f32.mrf.mxu1  ;;  %v1140_v62 = vld [vmem:[#allocation2 + $0xa] sm:$0xff] }
 0x54d   :  { %v1120_v63 = vadd.f32 %v1535_v39, %v1119_v61  ;;  %v1155_v1 = vld [vmem:[#allocation2 + $0x6] sm:$0xff]  ;;  %v1674_v7 = vpack.i.bf16 %v1140_v62, %v1139_v2  ;;  %v1156_v15 = vld [vmem:[#allocation2 + $0xe] sm:$0xff] }
 0x54e   :  { %1670 = vrot.lane.b32.xlu0 %v1669_v59, %s1717_s16  ;;  %v1121_v0 = vpop.f32.mrf.mxu1  ;;  %v1144_v8 = vld [vmem:[#allocation2 + $0xb] sm:$0xff] }
 0x54f   :  { %v1126_v4 = vmax.f32 %v1120_v63, 0.0  ;;  %1227 = vrot.lane.b32.xlu1 %v1155_v1, %s1718_s17  ;;  %v1679_v13 = vpack.i.bf16 %v1144_v8, %v1143_v11  ;;  %v1147_v35 = vld [vmem:[#allocation2 + $0x4] sm:$0xff]  ;;  %v1148_v49 = vld [vmem:[#allocation2 + $0xc] sm:$0xff] }
 0x550   :  { %v1132_v55 = vld [vmem:[#allocation2 + $0x8] sm:$0xff] }
 0x551   :  { %1130 = vst.msk [vmem:[#allocation2 + $0x23] sm:$0xff] %vm153_vm0, %v1126_v4  ;;  %v1145_v14 = vld [vmem:[#allocation2 + $0x1b] sm:$0xff] }
 0x552   :  { %1675 = vrot.lane.b32.xlu0 %v1674_v7, %s1718_s17  ;;  %v1137_v17 = vld [vmem:[#allocation2 + $0x19] sm:$0xff] }
 0x553   :  { %1213 = vrot.lane.b32.xlu1 %v1152_v10, %s1717_s16  ;;  %v1141_v23 = vld [vmem:[#allocation2 + $0x1a] sm:$0xff] }
 0x554   :  { %v1133_v1 = vld [vmem:[#allocation2 + $0x18] sm:$0xff] }
 0x556   :  { %1680 = vrot.lane.b32.xlu0 %v1679_v13, %s1719_s25 }
 0x557   :  { %1199 = vrot.lane.b32.xlu1 %v1145_v14, %s1719_s25 }
 0x558   :  { %v1138_v18 = vld [vmem:[#allocation2 + $0x21] sm:$0xff] }
 0x559   :  { %v1684_v20 = vpack.i.bf16 %v1138_v18, %v1137_v17  ;;  %v1142_v21 = vld [vmem:[#allocation2 + $0x22] sm:$0xff] }
 0x55a   :  { %1229 = vrot.lane.b32.xlu0 %v1156_v15, %s1718_s17  ;;  %v1153_v22 = vld [vmem:[#allocation2 + $0x1d] sm:$0xff]  ;;  %v1689_v24 = vpack.i.bf16 %v1142_v21, %v1141_v23  ;;  %v1158_v26 = vld [vmem:[#allocation2 + $0x26] sm:$0xff] }
 0x55b   :  { %1685 = vrot.lane.b32.xlu1 %v1684_v20, %s1717_s16  ;;  %v1157_v25 = vld [vmem:[#allocation2 + $0x1e] sm:$0xff] }
 0x55c   :  { %v1154_v27 = vld [vmem:[#allocation2 + $0x25] sm:$0xff]  ;;  %v1149_v63 = vld [vmem:[#allocation2 + $0x1c] sm:$0xff] }
 0x55d   :  { %v1146_v29 = vld [vmem:[#allocation2 + $0x23] sm:$0xff] }
 0x55e   :  { %1215 = vrot.lane.b32.xlu0 %v1153_v22, %s1717_s16  ;;  %v1150_v15 = vld [vmem:[#allocation2 + $0x24] sm:$0xff] }
 0x55f   :  { %1690 = vrot.lane.b32.xlu1 %v1689_v24, %s1718_s17  ;;  %v1134_v22 = vld [vmem:[#allocation2 + $0x20] sm:$0xff] }
 0x562   :  { %1231 = vrot.lane.b32.xlu0 %v1157_v25, %s1718_s17 }
 0x563   :  { %1233 = vrot.lane.b32.xlu1 %v1158_v26, %s1718_s17 }
 0x566   :  { %1217 = vrot.lane.b32.xlu0 %v1154_v27, %s1717_s16  ;;  %v1420_v27 = vld [vmem:[%s2767_s11 + $0x18] sm:$0xff] }
 0x567   :  { %1553 = vmatpush3.msra.mxu1 %v1420_v27 }
 0x568   :  { %1554 = vmatprep.subr.mxu1 %v1716_v5 }
 0x56a   :  { %1201 = vrot.lane.b32.xlu0 %v1146_v29, %s1719_s25  ;;  %v1419_v29 = vld [vmem:[%s2767_s11 + $0x10] sm:$0xff] }
 0x56b   :  { %1555 = vmatpush3.msra.mxu1 %v1419_v29 }
 0x56c   :  { %1556 = vmatprep.subr.mxu1 %v1716_v5 }
 0x5bd   :  { %v1212_v30 = vpop.permute.xlu1 %1211 }
 0x5be   :  { %v1251_v36 = vsel %vm153_vm0, %v1147_v35, %v1212_v30  ;;  %v1418_v30 = vld [vmem:[%s2767_s11 + $0x8] sm:$0xff]  ;;  %v1540_v35 = vld [vmem:[%s2766_s10] ss:$0 sm:$0xff] }
 0x5bf   :  { %1557 = vmatpush3.msra.mxu1 %v1418_v30 }
 0x5c0   :  { %v1671_v33 = vpop.permute.xlu0 %1670  ;;  %1558 = vmatprep.subr.mxu1 %v1716_v5 }
 0x5c1   :  { %v1228_v37 = vpop.permute.xlu1 %1227  ;;  %v1672_v9 = vunpack.i.l.bf16 %v1671_v33  ;;  %v1673_v16 = vunpack.i.h.bf16 %v1671_v33  ;;  %v1417_v33 = vld [vmem:[%s2767_s11] sm:$0xff] }
 0x5c2   :  { %v1255_v6 = vsel %vm158_vm2, %v1251_v36, %v1228_v37  ;;  %1559 = vmatpush3.msra.mxu1 %v1417_v33 }
 0x5c3   :  { %1541 = vmatprep.mubr.msk.f32.mxu0 %vm163_vm1, %v1255_v6  ;;  %v1239_v19 = vsel %vm153_vm0, %v1131_v42, %v1672_v9  ;;  %v1240_v58 = vsel %vm153_vm0, %v1132_v55, %v1673_v16 }
 0x5c4   :  { %v1676_v39 = vpop.permute.xlu0 %1675 }
 0x5c5   :  { %v1677_v12 = vunpack.i.l.bf16 %v1676_v39  ;;  %v1214_v40 = vpop.permute.xlu1 %1213  ;;  %v1678_v46 = vunpack.i.h.bf16 %v1676_v39 }
 0x5c6   :  { %v1252_v52 = vsel %vm153_vm0, %v1148_v49, %v1214_v40 }
 0x5c7   :  { %v1243_v47 = vsel %vm158_vm2, %v1239_v19, %v1677_v12  ;;  %v1244_v32 = vsel %vm158_vm2, %v1240_v58, %v1678_v46 }
 0x5c8   :  { %v1681_v43 = vpop.permute.xlu0 %1680 }
 0x5c9   :  { %v1682_v45 = vunpack.i.l.bf16 %v1681_v43  ;;  %v1200_v48 = vpop.permute.xlu1 %1199  ;;  %v1683_v50 = vunpack.i.h.bf16 %v1681_v43 }
 0x5cb   :  { %v1247_v51 = vsel %vm163_vm1, %v1243_v47, %v1682_v45  ;;  %v1248_v59 = vsel %vm163_vm1, %v1244_v32, %v1683_v50 }
 0x5cc   :  { %v1230_v54 = vpop.permute.xlu0 %1229  ;;  %1371 = vmatmul.mubr.f32.vlgmr.msra.gmra.mxu0 %v1247_v51 }
 0x5cd   :  { %v1256_v57 = vsel %vm158_vm2, %v1252_v52, %v1230_v54  ;;  %v1686_v28 = vpop.permute.xlu1 %1685 }
 0x5ce   :  { %1542 = vmatprep.mubr.msk.f32.mxu0 %vm163_vm1, %v1256_v57  ;;  %v1687_v60 = vunpack.i.l.bf16 %v1686_v28  ;;  %v1688_v13 = vunpack.i.h.bf16 %v1686_v28 }
 0x5d0   :  { %v1216_v61 = vpop.permute.xlu0 %1215  ;;  %1376 = vmatmul.mubr.f32.gmra.mxu0 %v1248_v59  ;;  %v1241_v7 = vsel %vm153_vm0, %v1133_v1, %v1687_v60  ;;  %v1242_v23 = vsel %vm153_vm0, %v1134_v22, %v1688_v13 }
 0x5d1   :  { %v1691_v62 = vpop.permute.xlu1 %1690  ;;  %v1253_v2 = vsel %vm153_vm0, %v1149_v63, %v1216_v61 }
 0x5d2   :  { %v1692_v0 = vunpack.i.l.bf16 %v1691_v62  ;;  %v1693_v14 = vunpack.i.h.bf16 %v1691_v62 }
 0x5d4   :  { %v1232_v4 = vpop.permute.xlu0 %1231  ;;  %v1245_v10 = vsel %vm158_vm2, %v1241_v7, %v1692_v0  ;;  %v1246_v25 = vsel %vm158_vm2, %v1242_v23, %v1693_v14 }
 0x5d5   :  { %v1257_v8 = vsel %vm158_vm2, %v1253_v2, %v1232_v4  ;;  %v1249_v11 = vsel %vm163_vm1, %v1245_v10, %v1200_v48  ;;  %v1234_v18 = vpop.permute.xlu1 %1233 }
 0x5d6   :  { %1543 = vmatprep.mubr.msk.f32.mxu0 %vm163_vm1, %v1257_v8 }
 0x5d7   :  { %1381 = vmatmul.mubr.f32.gmra.mxu0 %v1249_v11 }
 0x5d8   :  { %v1218_v17 = vpop.permute.xlu0 %1217 }
 0x5d9   :  { %v1254_v20 = vsel %vm153_vm0, %v1150_v15, %v1218_v17 }
 0x5da   :  { %v1258_v21 = vsel %vm158_vm2, %v1254_v20, %v1234_v18 }
 0x5db   :  { %1544 = vmatprep.mubr.msk.f32.mxu0 %vm163_vm1, %v1258_v21 }
 0x5dc   :  { %v1202_v24 = vpop.permute.xlu0 %1201 }
 0x5dd   :  { %v1250_v26 = vsel %vm163_vm1, %v1246_v25, %v1202_v24 }
 0x5de   :  { %1386 = vmatmul.mubr.f32.gmra.mxu0 %v1250_v26 }
 0x68c   :  { %v1372_v36 = vpop.f32.mrf.mxu0 }
 0x68d   :  { %v1373_v37 = vadd.f32 %v1540_v35, %v1372_v36 }
 0x68e   :  { %v1374_v6 = vpop.f32.mrf.mxu0 }
 0x68f   :  { %v1391_v9 = vadd.f32 %v1373_v37, %v855_v34 }
 0x690   :  { %v1377_v39 = vpop.f32.mrf.mxu0 }
 0x691   :  { %v1378_v12 = vadd.f32 %v1540_v35, %v1377_v39  ;;  %v1395_v43 = vmax.f32 %v1391_v9, 0.0 }
 0x692   :  { %v1379_v40 = vpop.f32.mrf.mxu0 }
 0x693   :  { %v1392_v42 = vadd.f32 %v1378_v12, %v856_v3  ;;  %v1399_v45 = vsel %vm153_vm0, %v1395_v43, -inf }
 0x695   :  { %v1396_v16 = vmax.f32 %v1392_v42, 0.0 }
 0x697   :  { %v1400_v5 = vsel %vm153_vm0, %v1396_v16, -inf  ;;  %v1382_v19 = vpop.f32.mrf.mxu0 }
 0x698   :  { %v1383_v46 = vadd.f32 %v1540_v35, %v1382_v19  ;;  %v1401_v48 = vmax.f32 %v1399_v45, %v1400_v5 }
 0x699   :  { %v1384_v47 = vpop.f32.mrf.mxu0 }
 0x69a   :  { %v1393_v49 = vadd.f32 %v1383_v46, %v857_v44  ;;  %v1402_v31 = vrot.slane %v1401_v48, 4 }
 0x69c   :  { %v1397_v52 = vmax.f32 %v1393_v49, 0.0  ;;  %v1403_v3 = vmax.f32 %v1401_v48, %v1402_v31 }
 0x69e   :  { %v1387_v34 = vpop.f32.mrf.mxu0  ;;  %v1408_v55 = vsel %vm153_vm0, %v1397_v52, -inf  ;;  %v1404_v58 = vrot.slane %v1403_v3, 2 }
 0x69f   :  { %v1388_v50 = vadd.f32 %v1540_v35, %v1387_v34 }
 0x6a0   :  { %v1389_v51 = vpop.f32.mrf.mxu0  ;;  %v1405_v59 = vmax.f32 %v1403_v3, %v1404_v58 }
 0x6a1   :  { %v1394_v38 = vadd.f32 %v1388_v50, %v858_v56  ;;  %v1545_v56 = vld [vmem:[%s2768_s12] ss:$0 sm:$0xff] }
 0x6a2   :  { %v1406_v60 = vrot.slane %v1405_v59, 1 }
 0x6a3   :  { %v1398_v54 = vmax.f32 %v1394_v38, 0.0 }
 0x6a4   :  { %v1407_v63 = vmax.f32 %v1405_v59, %v1406_v60 }
 0x6a5   :  { %v1409_v57 = vsel %vm153_vm0, %v1398_v54, -inf }
 0x6a6   :  { %v1410_v28 = vmax.f32 %v1408_v55, %v1409_v57 }
 0x6a8   :  { %v1411_v32 = vrot.slane %v1410_v28, 4 }
 0x6aa   :  { %v1412_v41 = vmax.f32 %v1410_v28, %v1411_v32 }
 0x6ac   :  { %v1413_v44 = vrot.slane %v1412_v41, 2 }
 0x6ae   :  { %v1414_v61 = vmax.f32 %v1412_v41, %v1413_v44 }
 0x6b0   :  { %v1415_v62 = vrot.slane %v1414_v61, 1 }
 0x6b2   :  { %v1416_v0 = vmax.f32 %v1414_v61, %v1415_v62 }
 0x6b4   :  { %v1431_v53 = vsel %vm1430_vm5, %v1416_v0, %v1407_v63 }
 0x6b5   :  { %1561 = vmatmul.mubr.msk.f32.vlgmr.msra.gmra.mxu1 %vm153_vm0, %v1431_v53 }
 0x775   :  { %v1500_v1 = vpop.f32.mrf.mxu1 }
 0x776   :  { %v1501_v2 = vadd.f32 %v1545_v56, %v1500_v1 }
 0x777   :  { %v1562_v4 = vpop.f32.mrf.mxu1 }
 0x778   :  { %1505 = vst.msk [vmem:[#allocation3] sm:$0x3] %vm1504_vm6, %v1501_v2 }
 0x779   :  { %1705 = shalt.err (!%p1702_p4)
}
 0x77a   :  { %1515 = dma.vmem_to_hbm [thread:$0]  %s1513_s28, 32, %s2769_s13, [#allocation4]  }
 0x77b   :  { %1714 = dma.done.wait [#allocation4], 32  }
 0x77c   :  { %1715 = vsyncadd [#allocation4], 4294967264 }
 0x77d   :  { %1519 = vsyncpa [#allocation4], 1 }

</bundles_post_ra>
